<compile_context>
chip_gen: v5e
topology: v5e:2x2
jax: 0.10.0
libtpu: 0.0.40
codegen_flags: <defaults>
</compile_context>

<pallas_src>
import functools

import jax
import jax.numpy as jnp
from jax.experimental import pallas as pl
from jax.experimental.pallas import tpu as pltpu


def _round_up(x, m):
    return ((x + m - 1) // m) * m


def _choose_tiling(n):
    """Pick (n_pad, dst_tile, src_tile) for the attention kernel.

    dst rows are tiled in multiples of 16 sublanes (bf16 adj packing), capped at 128;
    once the padded node range no longer fits a single lane block, the src axis is
    streamed in 256-wide steps (online softmax), so per-step VMEM stays bounded.
    """
    n16 = _round_up(n, 16)
    if n16 <= 512:
        dst_tile = min(128, n16)
        n_pad = _round_up(n16, dst_tile)
        src_tile = n_pad            # single src step covering the whole padded range
    else:
        dst_tile = 128              # >=2 dst tiles -> "parallel" axis can use both v7x cores
        src_tile = 256
        n_pad = _round_up(n16, 256)
    return n_pad, dst_tile, src_tile


# ---------------------------------------------------------------------------
# Prologue kernel: per-layer projection + per-head attention logits (runs ONCE
# per layer over node-row tiles; this work used to be redone for every dst tile).
# ---------------------------------------------------------------------------
def _project_kernel(x_ref, w_ref, asrc_ref, adst_ref, xp_ref, as_ref, ad_ref,
                    *, heads, out_ch):
    # x_ref : [Tn, Fin]   bf16  node-feature row tile
    # w_ref : [Fin, H*C]  bf16  head-concatenated projection weights
    # asrc_ref / adst_ref : [1, H*C] f32 attention vectors
    # xp_ref: [Tn, H*C]   bf16  projected features (consumed by the attention kernel)
    # as_ref / ad_ref : [Tn, H] f32 per-head src / dst attention logits
    xp = jnp.dot(x_ref[...], w_ref[...], preferred_element_type=jnp.float32)   # MXU, f32 acc
    xp_ref[...] = xp.astype(xp_ref.dtype)
    sw = xp * asrc_ref[...]
    dw = xp * adst_ref[...]
    s_cols, d_cols = [], []
    for h in range(heads):                       # static unroll; once per layer, not per tile
        sl = slice(h * out_ch, (h + 1) * out_ch)
        s_cols.append(jnp.sum(sw[:, sl], axis=-1, keepdims=True))
        d_cols.append(jnp.sum(dw[:, sl], axis=-1, keepdims=True))
    as_ref[...] = s_cols[0] if heads == 1 else jnp.concatenate(s_cols, axis=-1)
    ad_ref[...] = d_cols[0] if heads == 1 else jnp.concatenate(d_cols, axis=-1)


# ---------------------------------------------------------------------------
# Main kernel: masked multi-head attention with flash-style online softmax.
# Grid = (dst tiles ["parallel"], src tiles ["arbitrary"]).
# ---------------------------------------------------------------------------
def _gat_attn_kernel(adst_ref, asrc_ref, adj_ref, xp_ref, bias_ref, out_ref,
                     m_sc, l_sc, acc_sc, *, heads, out_ch, concat, apply_silu):
    # adst_ref: [H, Td, 1] f32   dst attention logits (dst-row tile)
    # asrc_ref: [H, 1, Ts] f32   src attention logits (src-column tile)
    # adj_ref : [Td, Ts]   bf16  0/1 edge mask adj[dst, src] (self loops included)
    # xp_ref  : [H, Ts, C] bf16  projected src features
    # bias_ref: [1, Dout]  f32
    # out_ref : [Td, Dout]
    # scratch : m/l [H, Td, 1] f32, acc [H, Td, C] f32  (online-softmax state)
    f32 = jnp.float32
    j = pl.program_id(1)

    @pl.when(j == 0)
    def _():
        m_sc[...] = jnp.full(m_sc.shape, -jnp.inf, f32)
        l_sc[...] = jnp.zeros(l_sc.shape, f32)
        acc_sc[...] = jnp.zeros(acc_sc.shape, f32)

    # scores[h, i, s] = LeakyReLU(a_dst[h, i] + a_src[h, s]); all heads in one 3-D block.
    s = adst_ref[...] + asrc_ref[...]                              # [H, Td, Ts]
    s = jnp.maximum(s, 0.2 * s)                                    # LeakyReLU(0.2): 2 VPU ops

    m_prev = m_sc[...]
    m_new = jnp.maximum(m_prev, jnp.max(s, axis=-1, keepdims=True))
    alpha = jnp.exp(m_prev - m_new)                                # rescale previous partials
    # Multiplicative edge mask after exp (no -1e30 add / select, no has_edge reduce).
    p = jnp.exp(s - m_new) * adj_ref[...].astype(f32)[None, :, :]  # [H, Td, Ts]
    l_sc[...] = alpha * l_sc[...] + jnp.sum(p, axis=-1, keepdims=True)
    acc_sc[...] = alpha * acc_sc[...] + jnp.einsum(
        "hts,hsc->htc", p.astype(jnp.bfloat16), xp_ref[...],
        preferred_element_type=f32)                                # batched MXU matmul (heads)
    m_sc[...] = m_new

    @pl.when(j == pl.num_programs(1) - 1)
    def _():
        l = l_sc[...]
        inv = pl.reciprocal(jnp.where(l > 0.0, l, 1.0), approx=True)   # EUP divide
        o = jnp.where(l > 0.0, acc_sc[...] * inv, 0.0)             # isolated / padded rows -> 0
        if concat:
            out = o[0] if heads == 1 else jnp.concatenate(
                [o[h] for h in range(heads)], axis=-1)             # [Td, H*C]
        else:
            out = o[0] if heads == 1 else jnp.sum(o, axis=0) * (1.0 / heads)
        out = out + bias_ref[...]
        if apply_silu:
            out = out * jax.nn.sigmoid(out)                        # fused SiLU epilogue
        out_ref[...] = out.astype(out_ref.dtype)


def gat_conv(x, W, att_src, att_dst, bias, adj, *, heads, out_ch, concat,
             apply_silu, out_dtype, dst_tile, src_tile):
    """One GATConv layer: projection prologue kernel + flash-style attention kernel.

    x: [Np, Fin] bf16 (padded), W: [Fin, H*C] bf16, att_*: [1, H*C] f32, bias: [1, Dout] f32,
    adj: [Np, Np] bf16 0/1 mask adj[dst, src] with self loops on real nodes.
    """
    n_pad, fin = x.shape
    hc = heads * out_ch
    dout = hc if concat else out_ch

    # --- prologue: grid-invariant projection + per-head logits (once per layer) ---------
    xp, a_src, a_dst = pl.pallas_call(
        functools.partial(_project_kernel, heads=heads, out_ch=out_ch),
        out_shape=(jax.ShapeDtypeStruct((n_pad, hc), jnp.bfloat16),
                   jax.ShapeDtypeStruct((n_pad, heads), jnp.float32),
                   jax.ShapeDtypeStruct((n_pad, heads), jnp.float32)),
        grid_spec=pltpu.PrefetchScalarGridSpec(
            num_scalar_prefetch=0,
            grid=(n_pad // dst_tile,),
            in_specs=[
                pl.BlockSpec((dst_tile, fin), lambda i: (i, 0)),
                pl.BlockSpec((fin, hc), lambda i: (0, 0)),
                pl.BlockSpec((1, hc), lambda i: (0, 0)),
                pl.BlockSpec((1, hc), lambda i: (0, 0)),
            ],
            out_specs=(
                pl.BlockSpec((dst_tile, hc), lambda i: (i, 0)),
                pl.BlockSpec((dst_tile, heads), lambda i: (i, 0)),
                pl.BlockSpec((dst_tile, heads), lambda i: (i, 0)),
            ),
        ),
        compiler_params=pltpu.CompilerParams(
            dimension_semantics=("parallel",),
            vmem_limit_bytes=32 * 1024 * 1024),
    )(x, W, att_src, att_dst)

    # Layout plumbing (once per layer, plain XLA): head-major views so the attention kernel
    # needs no per-tile relayouts / transposes.
    xp_heads = xp.reshape(n_pad, heads, out_ch).transpose(1, 0, 2)      # [H, Np, C] bf16
    a_src_t = a_src.T.reshape(heads, 1, n_pad)                          # [H, 1, Np] f32
    a_dst_t = a_dst.T.reshape(heads, n_pad, 1)                          # [H, Np, 1] f32

    n_dst = n_pad // dst_tile
    n_src = n_pad // src_tile

    cost = pl.CostEstimate(
        flops=int(2 * heads * n_pad * n_pad * out_ch          # prob @ xp
                  + 8 * heads * n_pad * n_pad),                # score / online-softmax elementwise
        transcendentals=int(heads * n_pad * n_pad),
        bytes_accessed=int(2 * n_pad * n_pad                   # adj (bf16)
                           + 2 * heads * n_pad * out_ch        # xp_heads (bf16)
                           + 8 * heads * n_pad + 4 * dout
                           + n_pad * dout * jnp.dtype(out_dtype).itemsize),
    )

    out = pl.pallas_call(
        functools.partial(_gat_attn_kernel, heads=heads, out_ch=out_ch,
                          concat=concat, apply_silu=apply_silu),
        out_shape=jax.ShapeDtypeStruct((n_pad, dout), out_dtype),
        grid_spec=pltpu.PrefetchScalarGridSpec(
            num_scalar_prefetch=0,
            grid=(n_dst, n_src),
            in_specs=[
                pl.BlockSpec((heads, dst_tile, 1), lambda i, j: (0, i, 0)),       # a_dst
                pl.BlockSpec((heads, 1, src_tile), lambda i, j: (0, 0, j)),       # a_src
                pl.BlockSpec((dst_tile, src_tile), lambda i, j: (i, j)),          # adj tile
                pl.BlockSpec((heads, src_tile, out_ch), lambda i, j: (0, j, 0)),  # xp tile
                pl.BlockSpec((1, dout), lambda i, j: (0, 0)),                     # bias
            ],
            out_specs=pl.BlockSpec((dst_tile, dout), lambda i, j: (i, 0)),
            scratch_shapes=[
                pltpu.VMEM((heads, dst_tile, 1), jnp.float32),        # running max
                pltpu.VMEM((heads, dst_tile, 1), jnp.float32),        # running denom
                pltpu.VMEM((heads, dst_tile, out_ch), jnp.float32),   # accumulator
            ],
        ),
        compiler_params=pltpu.CompilerParams(
            dimension_semantics=("parallel", "arbitrary"),
            vmem_limit_bytes=32 * 1024 * 1024),
        cost_estimate=cost,
    )(a_dst_t, a_src_t, adj, xp_heads, bias)
    return out


def init_gat_params(key, input_dim, hidden_dim, output_dim, num_layers, heads):
    """Glorot-ish uniform init mirroring GATConv shapes (head-concatenated; W kept bf16)."""
    params = []
    dims = [(input_dim, hidden_dim, heads, True)]
    for _ in range(num_layers - 2):
        dims.append((hidden_dim * heads, hidden_dim, heads, True))
    dims.append((hidden_dim * heads, output_dim, 1, False))

    for (fin, c, h, concat) in dims:
        key, k1, k2, k3, k4 = jax.random.split(key, 5)
        hc = h * c
        a_w = (6.0 / (fin + hc)) ** 0.5
        W = jax.random.uniform(k1, (fin, hc), jnp.float32, -a_w, a_w).astype(jnp.bfloat16)
        a_att = (6.0 / (1 + c)) ** 0.5
        att_src = jax.random.uniform(k2, (1, hc), jnp.float32, -a_att, a_att)
        att_dst = jax.random.uniform(k3, (1, hc), jnp.float32, -a_att, a_att)
        dout = hc if concat else c
        bias = jax.random.uniform(k4, (1, dout), jnp.float32, -0.1, 0.1)
        params.append(dict(W=W, att_src=att_src, att_dst=att_dst, bias=bias,
                           heads=h, out_ch=c, concat=concat))
    return params


def edge_index_to_adj(edge_index, num_nodes, n_pad):
    """Dense bf16 adjacency adj[dst, src] = 1 with self loops on real nodes, zero padded."""
    src = edge_index[0]
    dst = edge_index[1]
    adj = jnp.zeros((n_pad, n_pad), jnp.float32)
    adj = adj.at[dst, src].set(1.0)
    diag = jnp.arange(num_nodes)
    adj = adj.at[diag, diag].set(1.0)            # GATConv add_self_loops=True (real nodes only)
    return adj.astype(jnp.bfloat16)


def gat_forward(params, x, edge_index):
    """GAT.forward with defaults use_dropout=False, use_batchnorm=False, use_residual=False."""
    # TODO(synk): BatchNorm1d / dropout / residual branches are disabled by default in the
    # reference module and are not implemented here.
    n = x.shape[0]
    n_pad, dst_tile, src_tile = _choose_tiling(n)
    adj = edge_index_to_adj(edge_index, n, n_pad)
    x = jnp.pad(x, ((0, n_pad - n), (0, 0))).astype(jnp.bfloat16)   # bf16 activations in HBM
    num_layers = len(params)
    for i, p in enumerate(params):
        last = i == num_layers - 1
        x = gat_conv(x, p["W"], p["att_src"], p["att_dst"], p["bias"], adj,
                     heads=p["heads"], out_ch=p["out_ch"], concat=p["concat"],
                     apply_silu=not last,
                     out_dtype=jnp.float32 if last else jnp.bfloat16,
                     dst_tile=dst_tile, src_tile=src_tile)
    return x[:n]


if __name__ == "__main__":
    # Small deterministic problem: 16 nodes, input_dim=8, hidden_dim=8, heads=4, output_dim=4,
    # num_layers=3  ->  layer dims: 8 -> 32 (4 heads x 8, concat) -> 32 -> 4 (1 head, mean).
    N = 16
    input_dim, hidden_dim, output_dim = 8, 8, 4
    num_layers, heads = 3, 4

    key = jax.random.PRNGKey(0)
    kx, kp = jax.random.split(key)
    x = jax.random.normal(kx, (N, input_dim), jnp.float32)

    # Deterministic directed ring graph: i -> (i+1)%N and i -> (i+2)%N (no self loops, no dups).
    src = jnp.concatenate([jnp.arange(N), jnp.arange(N)])
    dst = jnp.concatenate([(jnp.arange(N) + 1) % N, (jnp.arange(N) + 2) % N])
    edge_index = jnp.stack([src, dst]).astype(jnp.int32)   # [2, E]

    params = init_gat_params(kp, input_dim, hidden_dim, output_dim, num_layers, heads)

    out = jax.jit(functools.partial(gat_forward, params))(x, edge_index)
    out = jax.block_until_ready(out)
    assert out.shape == (N, output_dim), out.shape
    assert bool(jnp.all(jnp.isfinite(out)))
    print("KERNEL_OK")
</pallas_src>

<mosaic_0001>
module attributes {stable_mosaic.version = 11 : i64} {
  func.func @_project_kernel(%arg0: i32, %arg1: memref<16x8xbf16, #tpu.memory_space<vmem>>, %arg2: memref<8x32xbf16, #tpu.memory_space<vmem>>, %arg3: memref<1x32xf32, #tpu.memory_space<vmem>>, %arg4: memref<1x32xf32, #tpu.memory_space<vmem>>, %arg5: memref<16x32xbf16, #tpu.memory_space<vmem>>, %arg6: memref<16x4xf32, #tpu.memory_space<vmem>>, %arg7: memref<16x4xf32, #tpu.memory_space<vmem>>) attributes {dimension_semantics = [#tpu.dimension_semantics<parallel>], iteration_bounds = array<i64: 1>, scalar_prefetch = 0 : i64, scratch_operands = 0 : i64, tpu.core_type = #tpu.core_type<tc>, window_params = [{transform_indices = @transform_0, window_bounds = array<i64: 16, 8>}, {pipeline_mode = #tpu.pipeline_mode<synchronous>, transform_indices = @transform_1, window_bounds = array<i64: 8, 32>}, {pipeline_mode = #tpu.pipeline_mode<synchronous>, transform_indices = @transform_2, window_bounds = array<i64: 1, 32>}, {pipeline_mode = #tpu.pipeline_mode<synchronous>, transform_indices = @transform_3, window_bounds = array<i64: 1, 32>}, {transform_indices = @transform_4, window_bounds = array<i64: 16, 32>}, {transform_indices = @transform_5, window_bounds = array<i64: 16, 4>}, {transform_indices = @transform_6, window_bounds = array<i64: 16, 4>}]} {
    %c0 = arith.constant 0 : index
    %c0_0 = arith.constant 0 : index
    %0 = vector.load %arg1[%c0, %c0_0] : memref<16x8xbf16, #tpu.memory_space<vmem>>, vector<16x8xbf16>
    %c0_1 = arith.constant 0 : index
    %c0_2 = arith.constant 0 : index
    %1 = vector.load %arg2[%c0_1, %c0_2] : memref<8x32xbf16, #tpu.memory_space<vmem>>, vector<8x32xbf16>
    %cst = arith.constant dense<0.000000e+00> : vector<16x32xf32>
    %2 = tpu.matmul %0, %1, %cst {dimension_numbers = #tpu.dot_dimension_numbers<[1], [0], [0], [1], [0, 0, 1, 1], [], []>} : vector<16x8xbf16>, vector<8x32xbf16>, vector<16x32xf32> -> vector<16x32xf32>
    %3 = arith.truncf %2 : vector<16x32xf32> to vector<16x32xbf16>
    %c0_3 = arith.constant 0 : index
    %c0_4 = arith.constant 0 : index
    %4 = vector.load %arg5[%c0_3, %c0_4] : memref<16x32xbf16, #tpu.memory_space<vmem>>, vector<16x32xbf16>
    tpu.vector_store %arg5[%c0_3, %c0_4], %3 {strides = array<i32>} : memref<16x32xbf16, #tpu.memory_space<vmem>>, vector<16x32xbf16>,
    %c0_5 = arith.constant 0 : index
    %c0_6 = arith.constant 0 : index
    %5 = vector.load %arg3[%c0_5, %c0_6] : memref<1x32xf32, #tpu.memory_space<vmem>>, vector<1x32xf32>
    %6 = vector.broadcast %5 : vector<1x32xf32> to vector<16x32xf32>
    %7 = arith.mulf %2, %6 : vector<16x32xf32>
    %c0_7 = arith.constant 0 : index
    %c0_8 = arith.constant 0 : index
    %8 = vector.load %arg4[%c0_7, %c0_8] : memref<1x32xf32, #tpu.memory_space<vmem>>, vector<1x32xf32>
    %9 = vector.broadcast %8 : vector<1x32xf32> to vector<16x32xf32>
    %10 = arith.mulf %2, %9 : vector<16x32xf32>
    %11 = vector.extract_strided_slice %7 {offsets = [0, 0], sizes = [16, 8], strides = [1, 1]} : vector<16x32xf32> to vector<16x8xf32>
    %cst_9 = arith.constant dense<0.000000e+00> : vector<16xf32>
    %12 = vector.multi_reduction <add>, %11, %cst_9 [1] : vector<16x8xf32> to vector<16xf32>
    %13 = vector.shape_cast %12 : vector<16xf32> to vector<16x1xf32>
    %14 = vector.extract_strided_slice %10 {offsets = [0, 0], sizes = [16, 8], strides = [1, 1]} : vector<16x32xf32> to vector<16x8xf32>
    %cst_10 = arith.constant dense<0.000000e+00> : vector<16xf32>
    %15 = vector.multi_reduction <add>, %14, %cst_10 [1] : vector<16x8xf32> to vector<16xf32>
    %16 = vector.shape_cast %15 : vector<16xf32> to vector<16x1xf32>
    %17 = vector.extract_strided_slice %7 {offsets = [0, 8], sizes = [16, 8], strides = [1, 1]} : vector<16x32xf32> to vector<16x8xf32>
    %cst_11 = arith.constant dense<0.000000e+00> : vector<16xf32>
    %18 = vector.multi_reduction <add>, %17, %cst_11 [1] : vector<16x8xf32> to vector<16xf32>
    %19 = vector.shape_cast %18 : vector<16xf32> to vector<16x1xf32>
    %20 = vector.extract_strided_slice %10 {offsets = [0, 8], sizes = [16, 8], strides = [1, 1]} : vector<16x32xf32> to vector<16x8xf32>
    %cst_12 = arith.constant dense<0.000000e+00> : vector<16xf32>
    %21 = vector.multi_reduction <add>, %20, %cst_12 [1] : vector<16x8xf32> to vector<16xf32>
    %22 = vector.shape_cast %21 : vector<16xf32> to vector<16x1xf32>
    %23 = vector.extract_strided_slice %7 {offsets = [0, 16], sizes = [16, 8], strides = [1, 1]} : vector<16x32xf32> to vector<16x8xf32>
    %cst_13 = arith.constant dense<0.000000e+00> : vector<16xf32>
    %24 = vector.multi_reduction <add>, %23, %cst_13 [1] : vector<16x8xf32> to vector<16xf32>
    %25 = vector.shape_cast %24 : vector<16xf32> to vector<16x1xf32>
    %26 = vector.extract_strided_slice %10 {offsets = [0, 16], sizes = [16, 8], strides = [1, 1]} : vector<16x32xf32> to vector<16x8xf32>
    %cst_14 = arith.constant dense<0.000000e+00> : vector<16xf32>
    %27 = vector.multi_reduction <add>, %26, %cst_14 [1] : vector<16x8xf32> to vector<16xf32>
    %28 = vector.shape_cast %27 : vector<16xf32> to vector<16x1xf32>
    %29 = vector.extract_strided_slice %7 {offsets = [0, 24], sizes = [16, 8], strides = [1, 1]} : vector<16x32xf32> to vector<16x8xf32>
    %cst_15 = arith.constant dense<0.000000e+00> : vector<16xf32>
    %30 = vector.multi_reduction <add>, %29, %cst_15 [1] : vector<16x8xf32> to vector<16xf32>
    %31 = vector.shape_cast %30 : vector<16xf32> to vector<16x1xf32>
    %32 = vector.extract_strided_slice %10 {offsets = [0, 24], sizes = [16, 8], strides = [1, 1]} : vector<16x32xf32> to vector<16x8xf32>
    %cst_16 = arith.constant dense<0.000000e+00> : vector<16xf32>
    %33 = vector.multi_reduction <add>, %32, %cst_16 [1] : vector<16x8xf32> to vector<16xf32>
    %34 = vector.shape_cast %33 : vector<16xf32> to vector<16x1xf32>
    %35 = tpu.concatenate %13, %19, %25, %31 in 1 : vector<16x1xf32>, vector<16x1xf32>, vector<16x1xf32>, vector<16x1xf32> -> vector<16x4xf32>
    %c0_17 = arith.constant 0 : index
    %c0_18 = arith.constant 0 : index
    %36 = vector.load %arg6[%c0_17, %c0_18] : memref<16x4xf32, #tpu.memory_space<vmem>>, vector<16x4xf32>
    tpu.vector_store %arg6[%c0_17, %c0_18], %35 {strides = array<i32>} : memref<16x4xf32, #tpu.memory_space<vmem>>, vector<16x4xf32>,
    %37 = tpu.concatenate %16, %22, %28, %34 in 1 : vector<16x1xf32>, vector<16x1xf32>, vector<16x1xf32>, vector<16x1xf32> -> vector<16x4xf32>
    %c0_19 = arith.constant 0 : index
    %c0_20 = arith.constant 0 : index
    %38 = vector.load %arg7[%c0_19, %c0_20] : memref<16x4xf32, #tpu.memory_space<vmem>>, vector<16x4xf32>
    tpu.vector_store %arg7[%c0_19, %c0_20], %37 {strides = array<i32>} : memref<16x4xf32, #tpu.memory_space<vmem>>, vector<16x4xf32>,
    return
  }
  func.func @transform_0(%arg0: i32) -> (i32, i32) {
    %c0_i32 = arith.constant 0 : i32
    %c0_i32_0 = arith.constant 0 : i32
    return %arg0, %c0_i32 : i32, i32
  }
  func.func @transform_1(%arg0: i32) -> (i32, i32) {
    %c0_i32 = arith.constant 0 : i32
    %c0_i32_0 = arith.constant 0 : i32
    %c0_i32_1 = arith.constant 0 : i32
    return %c0_i32, %c0_i32_0 : i32, i32
  }
  func.func @transform_2(%arg0: i32) -> (i32, i32) {
    %c0_i32 = arith.constant 0 : i32
    %c0_i32_0 = arith.constant 0 : i32
    %c0_i32_1 = arith.constant 0 : i32
    return %c0_i32, %c0_i32_0 : i32, i32
  }
  func.func @transform_3(%arg0: i32) -> (i32, i32) {
    %c0_i32 = arith.constant 0 : i32
    %c0_i32_0 = arith.constant 0 : i32
    %c0_i32_1 = arith.constant 0 : i32
    return %c0_i32, %c0_i32_0 : i32, i32
  }
  func.func @transform_4(%arg0: i32) -> (i32, i32) {
    %c0_i32 = arith.constant 0 : i32
    %c0_i32_0 = arith.constant 0 : i32
    return %arg0, %c0_i32 : i32, i32
  }
  func.func @transform_5(%arg0: i32) -> (i32, i32) {
    %c0_i32 = arith.constant 0 : i32
    %c0_i32_0 = arith.constant 0 : i32
    return %arg0, %c0_i32 : i32, i32
  }
  func.func @transform_6(%arg0: i32) -> (i32, i32) {
    %c0_i32 = arith.constant 0 : i32
    %c0_i32_0 = arith.constant 0 : i32
    return %arg0, %c0_i32 : i32, i32
  }
}

module attributes {stable_mosaic.version = 11 : i64} {
  func.func @_gat_attn_kernel(%arg0: i32, %arg1: i32, %arg2: memref<4x16x1xf32, #tpu.memory_space<vmem>>, %arg3: memref<4x1x16xf32, #tpu.memory_space<vmem>>, %arg4: memref<16x16xbf16, #tpu.memory_space<vmem>>, %arg5: memref<4x16x8xbf16, #tpu.memory_space<vmem>>, %arg6: memref<1x32xf32, #tpu.memory_space<vmem>>, %arg7: memref<16x32xbf16, #tpu.memory_space<vmem>>, %arg8: memref<4x16x1xf32, #tpu.memory_space<vmem>>, %arg9: memref<4x16x1xf32, #tpu.memory_space<vmem>>, %arg10: memref<4x16x8xf32, #tpu.memory_space<vmem>>) attributes {dimension_semantics = [#tpu.dimension_semantics<parallel>, #tpu.dimension_semantics<arbitrary>], iteration_bounds = array<i64: 1, 1>, scalar_prefetch = 0 : i64, scratch_operands = 3 : i64, tpu.core_type = #tpu.core_type<tc>, window_params = [{transform_indices = @transform_0, window_bounds = array<i64: 4, 16, 1>}, {transform_indices = @transform_1, window_bounds = array<i64: 4, 1, 16>}, {transform_indices = @transform_2, window_bounds = array<i64: 16, 16>}, {transform_indices = @transform_3, window_bounds = array<i64: 4, 16, 8>}, {pipeline_mode = #tpu.pipeline_mode<synchronous>, transform_indices = @transform_4, window_bounds = array<i64: 1, 32>}, {transform_indices = @transform_5, window_bounds = array<i64: 16, 32>}]} {
    %c0_i32 = arith.constant 0 : i32
    %0 = arith.cmpi eq, %arg1, %c0_i32 : i32
    %1 = arith.extui %0 : i1 to i32
    %c0_i32_0 = arith.constant 0 : i32
    %2 = arith.cmpi ne, %1, %c0_i32_0 : i32
    scf.if %2 {
      %cst_34 = arith.constant 0xFF800000 : f32
      %43 = vector.broadcast %cst_34 : f32 to vector<4x16x1xf32>
      %c0_35 = arith.constant 0 : index
      %c0_36 = arith.constant 0 : index
      %c0_37 = arith.constant 0 : index
      %44 = vector.load %arg8[%c0_35, %c0_36, %c0_37] : memref<4x16x1xf32, #tpu.memory_space<vmem>>, vector<4x16x1xf32>
      tpu.vector_store %arg8[%c0_35, %c0_36, %c0_37], %43 {strides = array<i32>} : memref<4x16x1xf32, #tpu.memory_space<vmem>>, vector<4x16x1xf32>,
      %cst_38 = arith.constant 0.000000e+00 : f32
      %45 = vector.broadcast %cst_38 : f32 to vector<4x16x1xf32>
      %c0_39 = arith.constant 0 : index
      %c0_40 = arith.constant 0 : index
      %c0_41 = arith.constant 0 : index
      %46 = vector.load %arg9[%c0_39, %c0_40, %c0_41] : memref<4x16x1xf32, #tpu.memory_space<vmem>>, vector<4x16x1xf32>
      tpu.vector_store %arg9[%c0_39, %c0_40, %c0_41], %45 {strides = array<i32>} : memref<4x16x1xf32, #tpu.memory_space<vmem>>, vector<4x16x1xf32>,
      %cst_42 = arith.constant 0.000000e+00 : f32
      %47 = vector.broadcast %cst_42 : f32 to vector<4x16x8xf32>
      %c0_43 = arith.constant 0 : index
      %c0_44 = arith.constant 0 : index
      %c0_45 = arith.constant 0 : index
      %48 = vector.load %arg10[%c0_43, %c0_44, %c0_45] : memref<4x16x8xf32, #tpu.memory_space<vmem>>, vector<4x16x8xf32>
      tpu.vector_store %arg10[%c0_43, %c0_44, %c0_45], %47 {strides = array<i32>} : memref<4x16x8xf32, #tpu.memory_space<vmem>>, vector<4x16x8xf32>,
    } else {
    }
    %c0 = arith.constant 0 : index
    %c0_1 = arith.constant 0 : index
    %c0_2 = arith.constant 0 : index
    %3 = vector.load %arg2[%c0, %c0_1, %c0_2] : memref<4x16x1xf32, #tpu.memory_space<vmem>>, vector<4x16x1xf32>
    %c0_3 = arith.constant 0 : index
    %c0_4 = arith.constant 0 : index
    %c0_5 = arith.constant 0 : index
    %4 = vector.load %arg3[%c0_3, %c0_4, %c0_5] : memref<4x1x16xf32, #tpu.memory_space<vmem>>, vector<4x1x16xf32>
    %5 = vector.broadcast %3 : vector<4x16x1xf32> to vector<4x16x16xf32>
    %6 = vector.broadcast %4 : vector<4x1x16xf32> to vector<4x16x16xf32>
    %7 = arith.addf %5, %6 : vector<4x16x16xf32>
    %cst = arith.constant 2.000000e-01 : f32
    %8 = vector.broadcast %cst : f32 to vector<4x16x16xf32>
    %9 = arith.mulf %8, %7 : vector<4x16x16xf32>
    %10 = arith.maximumf %7, %9 : vector<4x16x16xf32>
    %c0_6 = arith.constant 0 : index
    %c0_7 = arith.constant 0 : index
    %c0_8 = arith.constant 0 : index
    %11 = vector.load %arg8[%c0_6, %c0_7, %c0_8] : memref<4x16x1xf32, #tpu.memory_space<vmem>>, vector<4x16x1xf32>
    %cst_9 = arith.constant dense<0xFF800000> : vector<4x16xf32>
    %12 = vector.multi_reduction <maximumf>, %10, %cst_9 [2] : vector<4x16x16xf32> to vector<4x16xf32>
    %13 = vector.shape_cast %12 : vector<4x16xf32> to vector<4x16x1xf32>
    %14 = arith.maximumf %11, %13 : vector<4x16x1xf32>
    %15 = arith.subf %11, %14 : vector<4x16x1xf32>
    %16 = math.exp %15 : vector<4x16x1xf32>
    %17 = vector.broadcast %14 : vector<4x16x1xf32> to vector<4x16x16xf32>
    %18 = arith.subf %10, %17 : vector<4x16x16xf32>
    %19 = math.exp %18 : vector<4x16x16xf32>
    %c0_10 = arith.constant 0 : index
    %c0_11 = arith.constant 0 : index
    %20 = vector.load %arg4[%c0_10, %c0_11] : memref<16x16xbf16, #tpu.memory_space<vmem>>, vector<16x16xbf16>
    %21 = arith.extf %20 : vector<16x16xbf16> to vector<16x16xf32>
    %22 = vector.shape_cast %21 : vector<16x16xf32> to vector<1x16x16xf32>
    %23 = vector.broadcast %22 : vector<1x16x16xf32> to vector<4x16x16xf32>
    %24 = arith.mulf %19, %23 : vector<4x16x16xf32>
    %c0_12 = arith.constant 0 : index
    %c0_13 = arith.constant 0 : index
    %c0_14 = arith.constant 0 : index
    %25 = vector.load %arg9[%c0_12, %c0_13, %c0_14] : memref<4x16x1xf32, #tpu.memory_space<vmem>>, vector<4x16x1xf32>
    %26 = arith.mulf %16, %25 : vector<4x16x1xf32>
    %cst_15 = arith.constant dense<0.000000e+00> : vector<4x16xf32>
    %27 = vector.multi_reduction <add>, %24, %cst_15 [2] : vector<4x16x16xf32> to vector<4x16xf32>
    %28 = vector.shape_cast %27 : vector<4x16xf32> to vector<4x16x1xf32>
    %29 = arith.addf %26, %28 : vector<4x16x1xf32>
    %c0_16 = arith.constant 0 : index
    %c0_17 = arith.constant 0 : index
    %c0_18 = arith.constant 0 : index
    %30 = vector.load %arg9[%c0_16, %c0_17, %c0_18] : memref<4x16x1xf32, #tpu.memory_space<vmem>>, vector<4x16x1xf32>
    tpu.vector_store %arg9[%c0_16, %c0_17, %c0_18], %29 {strides = array<i32>} : memref<4x16x1xf32, #tpu.memory_space<vmem>>, vector<4x16x1xf32>,
    %c0_19 = arith.constant 0 : index
    %c0_20 = arith.constant 0 : index
    %c0_21 = arith.constant 0 : index
    %31 = vector.load %arg10[%c0_19, %c0_20, %c0_21] : memref<4x16x8xf32, #tpu.memory_space<vmem>>, vector<4x16x8xf32>
    %32 = vector.broadcast %16 : vector<4x16x1xf32> to vector<4x16x8xf32>
    %33 = arith.mulf %32, %31 : vector<4x16x8xf32>
    %34 = arith.truncf %24 : vector<4x16x16xf32> to vector<4x16x16xbf16>
    %c0_22 = arith.constant 0 : index
    %c0_23 = arith.constant 0 : index
    %c0_24 = arith.constant 0 : index
    %35 = vector.load %arg5[%c0_22, %c0_23, %c0_24] : memref<4x16x8xbf16, #tpu.memory_space<vmem>>, vector<4x16x8xbf16>
    "tpu.trace_start"() <{level = 10 : i32, message = "hts,hsc->htc"}> : () -> ()
    %cst_25 = arith.constant dense<0.000000e+00> : vector<4x16x8xf32>
    %36 = tpu.matmul %34, %35, %cst_25 {dimension_numbers = #tpu.dot_dimension_numbers<[2], [1], [1], [2], [0, 0, 0, 1, 1, 2], [0], [0]>} : vector<4x16x16xbf16>, vector<4x16x8xbf16>, vector<4x16x8xf32> -> vector<4x16x8xf32>
    "tpu.trace_stop"() : () -> ()
    %37 = arith.addf %33, %36 : vector<4x16x8xf32>
    %c0_26 = arith.constant 0 : index
    %c0_27 = arith.constant 0 : index
    %c0_28 = arith.constant 0 : index
    %38 = vector.load %arg10[%c0_26, %c0_27, %c0_28] : memref<4x16x8xf32, #tpu.memory_space<vmem>>, vector<4x16x8xf32>
    tpu.vector_store %arg10[%c0_26, %c0_27, %c0_28], %37 {strides = array<i32>} : memref<4x16x8xf32, #tpu.memory_space<vmem>>, vector<4x16x8xf32>,
    %c0_29 = arith.constant 0 : index
    %c0_30 = arith.constant 0 : index
    %c0_31 = arith.constant 0 : index
    %39 = vector.load %arg8[%c0_29, %c0_30, %c0_31] : memref<4x16x1xf32, #tpu.memory_space<vmem>>, vector<4x16x1xf32>
    tpu.vector_store %arg8[%c0_29, %c0_30, %c0_31], %14 {strides = array<i32>} : memref<4x16x1xf32, #tpu.memory_space<vmem>>, vector<4x16x1xf32>,
    %c0_i32_32 = arith.constant 0 : i32
    %40 = arith.cmpi eq, %arg1, %c0_i32_32 : i32
    %41 = arith.extui %40 : i1 to i32
    %c0_i32_33 = arith.constant 0 : i32
    %42 = arith.cmpi ne, %41, %c0_i32_33 : i32
    scf.if %42 {
      %c0_34 = arith.constant 0 : index
      %c0_35 = arith.constant 0 : index
      %c0_36 = arith.constant 0 : index
      %43 = vector.load %arg9[%c0_34, %c0_35, %c0_36] : memref<4x16x1xf32, #tpu.memory_space<vmem>>, vector<4x16x1xf32>
      %cst_37 = arith.constant 0.000000e+00 : f32
      %44 = vector.broadcast %cst_37 : f32 to vector<4x16x1xf32>
      %45 = arith.cmpf ogt, %43, %44 : vector<4x16x1xf32>
      %cst_38 = arith.constant 1.000000e+00 : f32
      %46 = vector.broadcast %cst_38 : f32 to vector<4x16x1xf32>
      %47 = arith.select %45, %43, %46 : vector<4x16x1xi1>, vector<4x16x1xf32>
      %48 = tpu.reciprocal %47 {approx = true} : vector<4x16x1xf32> -> vector<4x16x1xf32>
      %cst_39 = arith.constant 0.000000e+00 : f32
      %49 = vector.broadcast %cst_39 : f32 to vector<4x16x1xf32>
      %50 = arith.cmpf ogt, %43, %49 : vector<4x16x1xf32>
      %c0_40 = arith.constant 0 : index
      %c0_41 = arith.constant 0 : index
      %c0_42 = arith.constant 0 : index
      %51 = vector.load %arg10[%c0_40, %c0_41, %c0_42] : memref<4x16x8xf32, #tpu.memory_space<vmem>>, vector<4x16x8xf32>
      %52 = vector.broadcast %48 : vector<4x16x1xf32> to vector<4x16x8xf32>
      %53 = arith.mulf %51, %52 : vector<4x16x8xf32>
      %cst_43 = arith.constant 0.000000e+00 : f32
      %54 = vector.shape_cast %50 : vector<4x16x1xi1> to vector<4x16x1xi1>
      %55 = vector.broadcast %54 : vector<4x16x1xi1> to vector<4x16x8xi1>
      %56 = vector.broadcast %cst_43 : f32 to vector<4x16x8xf32>
      %57 = arith.select %55, %53, %56 : vector<4x16x8xi1>, vector<4x16x8xf32>
      %58 = vector.extract_strided_slice %57 {offsets = [0, 0, 0], sizes = [1, 16, 8], strides = [1, 1, 1]} : vector<4x16x8xf32> to vector<1x16x8xf32>
      %59 = vector.shape_cast %58 : vector<1x16x8xf32> to vector<16x8xf32>
      %60 = vector.extract_strided_slice %57 {offsets = [1, 0, 0], sizes = [1, 16, 8], strides = [1, 1, 1]} : vector<4x16x8xf32> to vector<1x16x8xf32>
      %61 = vector.shape_cast %60 : vector<1x16x8xf32> to vector<16x8xf32>
      %62 = vector.extract_strided_slice %57 {offsets = [2, 0, 0], sizes = [1, 16, 8], strides = [1, 1, 1]} : vector<4x16x8xf32> to vector<1x16x8xf32>
      %63 = vector.shape_cast %62 : vector<1x16x8xf32> to vector<16x8xf32>
      %64 = vector.extract_strided_slice %57 {offsets = [3, 0, 0], sizes = [1, 16, 8], strides = [1, 1, 1]} : vector<4x16x8xf32> to vector<1x16x8xf32>
      %65 = vector.shape_cast %64 : vector<1x16x8xf32> to vector<16x8xf32>
      %66 = tpu.concatenate %59, %61, %63, %65 in 1 : vector<16x8xf32>, vector<16x8xf32>, vector<16x8xf32>, vector<16x8xf32> -> vector<16x32xf32>
      %c0_44 = arith.constant 0 : index
      %c0_45 = arith.constant 0 : index
      %67 = vector.load %arg6[%c0_44, %c0_45] : memref<1x32xf32, #tpu.memory_space<vmem>>, vector<1x32xf32>
      %68 = vector.broadcast %67 : vector<1x32xf32> to vector<16x32xf32>
      %69 = arith.addf %66, %68 : vector<16x32xf32>
      %70 = arith.negf %69 : vector<16x32xf32>
      %71 = math.exp %70 : vector<16x32xf32>
      %cst_46 = arith.constant 1.000000e+00 : f32
      %72 = vector.broadcast %cst_46 : f32 to vector<16x32xf32>
      %73 = arith.addf %72, %71 : vector<16x32xf32>
      %74 = arith.divf %72, %73 : vector<16x32xf32>
      %75 = arith.mulf %69, %74 : vector<16x32xf32>
      %76 = arith.truncf %75 : vector<16x32xf32> to vector<16x32xbf16>
      %c0_47 = arith.constant 0 : index
      %c0_48 = arith.constant 0 : index
      %77 = vector.load %arg7[%c0_47, %c0_48] : memref<16x32xbf16, #tpu.memory_space<vmem>>, vector<16x32xbf16>
      tpu.vector_store %arg7[%c0_47, %c0_48], %76 {strides = array<i32>} : memref<16x32xbf16, #tpu.memory_space<vmem>>, vector<16x32xbf16>,
    } else {
    }
    return
  }
  func.func @transform_0(%arg0: i32, %arg1: i32) -> (i32, i32, i32) {
    %c0_i32 = arith.constant 0 : i32
    %c0_i32_0 = arith.constant 0 : i32
    %c0_i32_1 = arith.constant 0 : i32
    return %c0_i32, %arg0, %c0_i32_0 : i32, i32, i32
  }
  func.func @transform_1(%arg0: i32, %arg1: i32) -> (i32, i32, i32) {
    %c0_i32 = arith.constant 0 : i32
    %c0_i32_0 = arith.constant 0 : i32
    %c0_i32_1 = arith.constant 0 : i32
    return %c0_i32, %c0_i32_0, %arg1 : i32, i32, i32
  }
  func.func @transform_2(%arg0: i32, %arg1: i32) -> (i32, i32) {
    %c0_i32 = arith.constant 0 : i32
    return %arg0, %arg1 : i32, i32
  }
  func.func @transform_3(%arg0: i32, %arg1: i32) -> (i32, i32, i32) {
    %c0_i32 = arith.constant 0 : i32
    %c0_i32_0 = arith.constant 0 : i32
    %c0_i32_1 = arith.constant 0 : i32
    return %c0_i32, %arg1, %c0_i32_0 : i32, i32, i32
  }
  func.func @transform_4(%arg0: i32, %arg1: i32) -> (i32, i32) {
    %c0_i32 = arith.constant 0 : i32
    %c0_i32_0 = arith.constant 0 : i32
    %c0_i32_1 = arith.constant 0 : i32
    return %c0_i32, %c0_i32_0 : i32, i32
  }
  func.func @transform_5(%arg0: i32, %arg1: i32) -> (i32, i32) {
    %c0_i32 = arith.constant 0 : i32
    %c0_i32_0 = arith.constant 0 : i32
    return %arg0, %c0_i32 : i32, i32
  }
}

module attributes {stable_mosaic.version = 11 : i64} {
  func.func @_project_kernel(%arg0: i32, %arg1: memref<16x32xbf16, #tpu.memory_space<vmem>>, %arg2: memref<32x32xbf16, #tpu.memory_space<vmem>>, %arg3: memref<1x32xf32, #tpu.memory_space<vmem>>, %arg4: memref<1x32xf32, #tpu.memory_space<vmem>>, %arg5: memref<16x32xbf16, #tpu.memory_space<vmem>>, %arg6: memref<16x4xf32, #tpu.memory_space<vmem>>, %arg7: memref<16x4xf32, #tpu.memory_space<vmem>>) attributes {dimension_semantics = [#tpu.dimension_semantics<parallel>], iteration_bounds = array<i64: 1>, scalar_prefetch = 0 : i64, scratch_operands = 0 : i64, tpu.core_type = #tpu.core_type<tc>, window_params = [{transform_indices = @transform_0, window_bounds = array<i64: 16, 32>}, {pipeline_mode = #tpu.pipeline_mode<synchronous>, transform_indices = @transform_1, window_bounds = array<i64: 32, 32>}, {pipeline_mode = #tpu.pipeline_mode<synchronous>, transform_indices = @transform_2, window_bounds = array<i64: 1, 32>}, {pipeline_mode = #tpu.pipeline_mode<synchronous>, transform_indices = @transform_3, window_bounds = array<i64: 1, 32>}, {transform_indices = @transform_4, window_bounds = array<i64: 16, 32>}, {transform_indices = @transform_5, window_bounds = array<i64: 16, 4>}, {transform_indices = @transform_6, window_bounds = array<i64: 16, 4>}]} {
    %c0 = arith.constant 0 : index
    %c0_0 = arith.constant 0 : index
    %0 = vector.load %arg1[%c0, %c0_0] : memref<16x32xbf16, #tpu.memory_space<vmem>>, vector<16x32xbf16>
    %c0_1 = arith.constant 0 : index
    %c0_2 = arith.constant 0 : index
    %1 = vector.load %arg2[%c0_1, %c0_2] : memref<32x32xbf16, #tpu.memory_space<vmem>>, vector<32x32xbf16>
    %cst = arith.constant dense<0.000000e+00> : vector<16x32xf32>
    %2 = tpu.matmul %0, %1, %cst {dimension_numbers = #tpu.dot_dimension_numbers<[1], [0], [0], [1], [0, 0, 1, 1], [], []>} : vector<16x32xbf16>, vector<32x32xbf16>, vector<16x32xf32> -> vector<16x32xf32>
    %3 = arith.truncf %2 : vector<16x32xf32> to vector<16x32xbf16>
    %c0_3 = arith.constant 0 : index
    %c0_4 = arith.constant 0 : index
    %4 = vector.load %arg5[%c0_3, %c0_4] : memref<16x32xbf16, #tpu.memory_space<vmem>>, vector<16x32xbf16>
    tpu.vector_store %arg5[%c0_3, %c0_4], %3 {strides = array<i32>} : memref<16x32xbf16, #tpu.memory_space<vmem>>, vector<16x32xbf16>,
    %c0_5 = arith.constant 0 : index
    %c0_6 = arith.constant 0 : index
    %5 = vector.load %arg3[%c0_5, %c0_6] : memref<1x32xf32, #tpu.memory_space<vmem>>, vector<1x32xf32>
    %6 = vector.broadcast %5 : vector<1x32xf32> to vector<16x32xf32>
    %7 = arith.mulf %2, %6 : vector<16x32xf32>
    %c0_7 = arith.constant 0 : index
    %c0_8 = arith.constant 0 : index
    %8 = vector.load %arg4[%c0_7, %c0_8] : memref<1x32xf32, #tpu.memory_space<vmem>>, vector<1x32xf32>
    %9 = vector.broadcast %8 : vector<1x32xf32> to vector<16x32xf32>
    %10 = arith.mulf %2, %9 : vector<16x32xf32>
    %11 = vector.extract_strided_slice %7 {offsets = [0, 0], sizes = [16, 8], strides = [1, 1]} : vector<16x32xf32> to vector<16x8xf32>
    %cst_9 = arith.constant dense<0.000000e+00> : vector<16xf32>
    %12 = vector.multi_reduction <add>, %11, %cst_9 [1] : vector<16x8xf32> to vector<16xf32>
    %13 = vector.shape_cast %12 : vector<16xf32> to vector<16x1xf32>
    %14 = vector.extract_strided_slice %10 {offsets = [0, 0], sizes = [16, 8], strides = [1, 1]} : vector<16x32xf32> to vector<16x8xf32>
    %cst_10 = arith.constant dense<0.000000e+00> : vector<16xf32>
    %15 = vector.multi_reduction <add>, %14, %cst_10 [1] : vector<16x8xf32> to vector<16xf32>
    %16 = vector.shape_cast %15 : vector<16xf32> to vector<16x1xf32>
    %17 = vector.extract_strided_slice %7 {offsets = [0, 8], sizes = [16, 8], strides = [1, 1]} : vector<16x32xf32> to vector<16x8xf32>
    %cst_11 = arith.constant dense<0.000000e+00> : vector<16xf32>
    %18 = vector.multi_reduction <add>, %17, %cst_11 [1] : vector<16x8xf32> to vector<16xf32>
    %19 = vector.shape_cast %18 : vector<16xf32> to vector<16x1xf32>
    %20 = vector.extract_strided_slice %10 {offsets = [0, 8], sizes = [16, 8], strides = [1, 1]} : vector<16x32xf32> to vector<16x8xf32>
    %cst_12 = arith.constant dense<0.000000e+00> : vector<16xf32>
    %21 = vector.multi_reduction <add>, %20, %cst_12 [1] : vector<16x8xf32> to vector<16xf32>
    %22 = vector.shape_cast %21 : vector<16xf32> to vector<16x1xf32>
    %23 = vector.extract_strided_slice %7 {offsets = [0, 16], sizes = [16, 8], strides = [1, 1]} : vector<16x32xf32> to vector<16x8xf32>
    %cst_13 = arith.constant dense<0.000000e+00> : vector<16xf32>
    %24 = vector.multi_reduction <add>, %23, %cst_13 [1] : vector<16x8xf32> to vector<16xf32>
    %25 = vector.shape_cast %24 : vector<16xf32> to vector<16x1xf32>
    %26 = vector.extract_strided_slice %10 {offsets = [0, 16], sizes = [16, 8], strides = [1, 1]} : vector<16x32xf32> to vector<16x8xf32>
    %cst_14 = arith.constant dense<0.000000e+00> : vector<16xf32>
    %27 = vector.multi_reduction <add>, %26, %cst_14 [1] : vector<16x8xf32> to vector<16xf32>
    %28 = vector.shape_cast %27 : vector<16xf32> to vector<16x1xf32>
    %29 = vector.extract_strided_slice %7 {offsets = [0, 24], sizes = [16, 8], strides = [1, 1]} : vector<16x32xf32> to vector<16x8xf32>
    %cst_15 = arith.constant dense<0.000000e+00> : vector<16xf32>
    %30 = vector.multi_reduction <add>, %29, %cst_15 [1] : vector<16x8xf32> to vector<16xf32>
    %31 = vector.shape_cast %30 : vector<16xf32> to vector<16x1xf32>
    %32 = vector.extract_strided_slice %10 {offsets = [0, 24], sizes = [16, 8], strides = [1, 1]} : vector<16x32xf32> to vector<16x8xf32>
    %cst_16 = arith.constant dense<0.000000e+00> : vector<16xf32>
    %33 = vector.multi_reduction <add>, %32, %cst_16 [1] : vector<16x8xf32> to vector<16xf32>
    %34 = vector.shape_cast %33 : vector<16xf32> to vector<16x1xf32>
    %35 = tpu.concatenate %13, %19, %25, %31 in 1 : vector<16x1xf32>, vector<16x1xf32>, vector<16x1xf32>, vector<16x1xf32> -> vector<16x4xf32>
    %c0_17 = arith.constant 0 : index
    %c0_18 = arith.constant 0 : index
    %36 = vector.load %arg6[%c0_17, %c0_18] : memref<16x4xf32, #tpu.memory_space<vmem>>, vector<16x4xf32>
    tpu.vector_store %arg6[%c0_17, %c0_18], %35 {strides = array<i32>} : memref<16x4xf32, #tpu.memory_space<vmem>>, vector<16x4xf32>,
    %37 = tpu.concatenate %16, %22, %28, %34 in 1 : vector<16x1xf32>, vector<16x1xf32>, vector<16x1xf32>, vector<16x1xf32> -> vector<16x4xf32>
    %c0_19 = arith.constant 0 : index
    %c0_20 = arith.constant 0 : index
    %38 = vector.load %arg7[%c0_19, %c0_20] : memref<16x4xf32, #tpu.memory_space<vmem>>, vector<16x4xf32>
    tpu.vector_store %arg7[%c0_19, %c0_20], %37 {strides = array<i32>} : memref<16x4xf32, #tpu.memory_space<vmem>>, vector<16x4xf32>,
    return
  }
  func.func @transform_0(%arg0: i32) -> (i32, i32) {
    %c0_i32 = arith.constant 0 : i32
    %c0_i32_0 = arith.constant 0 : i32
    return %arg0, %c0_i32 : i32, i32
  }
  func.func @transform_1(%arg0: i32) -> (i32, i32) {
    %c0_i32 = arith.constant 0 : i32
    %c0_i32_0 = arith.constant 0 : i32
    %c0_i32_1 = arith.constant 0 : i32
    return %c0_i32, %c0_i32_0 : i32, i32
  }
  func.func @transform_2(%arg0: i32) -> (i32, i32) {
    %c0_i32 = arith.constant 0 : i32
    %c0_i32_0 = arith.constant 0 : i32
    %c0_i32_1 = arith.constant 0 : i32
    return %c0_i32, %c0_i32_0 : i32, i32
  }
  func.func @transform_3(%arg0: i32) -> (i32, i32) {
    %c0_i32 = arith.constant 0 : i32
    %c0_i32_0 = arith.constant 0 : i32
    %c0_i32_1 = arith.constant 0 : i32
    return %c0_i32, %c0_i32_0 : i32, i32
  }
  func.func @transform_4(%arg0: i32) -> (i32, i32) {
    %c0_i32 = arith.constant 0 : i32
    %c0_i32_0 = arith.constant 0 : i32
    return %arg0, %c0_i32 : i32, i32
  }
  func.func @transform_5(%arg0: i32) -> (i32, i32) {
    %c0_i32 = arith.constant 0 : i32
    %c0_i32_0 = arith.constant 0 : i32
    return %arg0, %c0_i32 : i32, i32
  }
  func.func @transform_6(%arg0: i32) -> (i32, i32) {
    %c0_i32 = arith.constant 0 : i32
    %c0_i32_0 = arith.constant 0 : i32
    return %arg0, %c0_i32 : i32, i32
  }
}

module attributes {stable_mosaic.version = 11 : i64} {
  func.func @_project_kernel(%arg0: i32, %arg1: memref<16x32xbf16, #tpu.memory_space<vmem>>, %arg2: memref<32x4xbf16, #tpu.memory_space<vmem>>, %arg3: memref<1x4xf32, #tpu.memory_space<vmem>>, %arg4: memref<1x4xf32, #tpu.memory_space<vmem>>, %arg5: memref<16x4xbf16, #tpu.memory_space<vmem>>, %arg6: memref<16x1xf32, #tpu.memory_space<vmem>>, %arg7: memref<16x1xf32, #tpu.memory_space<vmem>>) attributes {dimension_semantics = [#tpu.dimension_semantics<parallel>], iteration_bounds = array<i64: 1>, scalar_prefetch = 0 : i64, scratch_operands = 0 : i64, tpu.core_type = #tpu.core_type<tc>, window_params = [{transform_indices = @transform_0, window_bounds = array<i64: 16, 32>}, {pipeline_mode = #tpu.pipeline_mode<synchronous>, transform_indices = @transform_1, window_bounds = array<i64: 32, 4>}, {pipeline_mode = #tpu.pipeline_mode<synchronous>, transform_indices = @transform_2, window_bounds = array<i64: 1, 4>}, {pipeline_mode = #tpu.pipeline_mode<synchronous>, transform_indices = @transform_3, window_bounds = array<i64: 1, 4>}, {transform_indices = @transform_4, window_bounds = array<i64: 16, 4>}, {transform_indices = @transform_5, window_bounds = array<i64: 16, 1>}, {transform_indices = @transform_6, window_bounds = array<i64: 16, 1>}]} {
    %c0 = arith.constant 0 : index
    %c0_0 = arith.constant 0 : index
    %0 = vector.load %arg1[%c0, %c0_0] : memref<16x32xbf16, #tpu.memory_space<vmem>>, vector<16x32xbf16>
    %c0_1 = arith.constant 0 : index
    %c0_2 = arith.constant 0 : index
    %1 = vector.load %arg2[%c0_1, %c0_2] : memref<32x4xbf16, #tpu.memory_space<vmem>>, vector<32x4xbf16>
    %cst = arith.constant dense<0.000000e+00> : vector<16x4xf32>
    %2 = tpu.matmul %0, %1, %cst {dimension_numbers = #tpu.dot_dimension_numbers<[1], [0], [0], [1], [0, 0, 1, 1], [], []>} : vector<16x32xbf16>, vector<32x4xbf16>, vector<16x4xf32> -> vector<16x4xf32>
    %3 = arith.truncf %2 : vector<16x4xf32> to vector<16x4xbf16>
    %c0_3 = arith.constant 0 : index
    %c0_4 = arith.constant 0 : index
    %4 = vector.load %arg5[%c0_3, %c0_4] : memref<16x4xbf16, #tpu.memory_space<vmem>>, vector<16x4xbf16>
    tpu.vector_store %arg5[%c0_3, %c0_4], %3 {strides = array<i32>} : memref<16x4xbf16, #tpu.memory_space<vmem>>, vector<16x4xbf16>,
    %c0_5 = arith.constant 0 : index
    %c0_6 = arith.constant 0 : index
    %5 = vector.load %arg3[%c0_5, %c0_6] : memref<1x4xf32, #tpu.memory_space<vmem>>, vector<1x4xf32>
    %6 = vector.broadcast %5 : vector<1x4xf32> to vector<16x4xf32>
    %7 = arith.mulf %2, %6 : vector<16x4xf32>
    %c0_7 = arith.constant 0 : index
    %c0_8 = arith.constant 0 : index
    %8 = vector.load %arg4[%c0_7, %c0_8] : memref<1x4xf32, #tpu.memory_space<vmem>>, vector<1x4xf32>
    %9 = vector.broadcast %8 : vector<1x4xf32> to vector<16x4xf32>
    %10 = arith.mulf %2, %9 : vector<16x4xf32>
    %cst_9 = arith.constant dense<0.000000e+00> : vector<16xf32>
    %11 = vector.multi_reduction <add>, %7, %cst_9 [1] : vector<16x4xf32> to vector<16xf32>
    %12 = vector.shape_cast %11 : vector<16xf32> to vector<16x1xf32>
    %cst_10 = arith.constant dense<0.000000e+00> : vector<16xf32>
    %13 = vector.multi_reduction <add>, %10, %cst_10 [1] : vector<16x4xf32> to vector<16xf32>
    %14 = vector.shape_cast %13 : vector<16xf32> to vector<16x1xf32>
    %c0_11 = arith.constant 0 : index
    %c0_12 = arith.constant 0 : index
    %15 = vector.load %arg6[%c0_11, %c0_12] : memref<16x1xf32, #tpu.memory_space<vmem>>, vector<16x1xf32>
    tpu.vector_store %arg6[%c0_11, %c0_12], %12 {strides = array<i32>} : memref<16x1xf32, #tpu.memory_space<vmem>>, vector<16x1xf32>,
    %c0_13 = arith.constant 0 : index
    %c0_14 = arith.constant 0 : index
    %16 = vector.load %arg7[%c0_13, %c0_14] : memref<16x1xf32, #tpu.memory_space<vmem>>, vector<16x1xf32>
    tpu.vector_store %arg7[%c0_13, %c0_14], %14 {strides = array<i32>} : memref<16x1xf32, #tpu.memory_space<vmem>>, vector<16x1xf32>,
    return
  }
  func.func @transform_0(%arg0: i32) -> (i32, i32) {
    %c0_i32 = arith.constant 0 : i32
    %c0_i32_0 = arith.constant 0 : i32
    return %arg0, %c0_i32 : i32, i32
  }
  func.func @transform_1(%arg0: i32) -> (i32, i32) {
    %c0_i32 = arith.constant 0 : i32
    %c0_i32_0 = arith.constant 0 : i32
    %c0_i32_1 = arith.constant 0 : i32
    return %c0_i32, %c0_i32_0 : i32, i32
  }
  func.func @transform_2(%arg0: i32) -> (i32, i32) {
    %c0_i32 = arith.constant 0 : i32
    %c0_i32_0 = arith.constant 0 : i32
    %c0_i32_1 = arith.constant 0 : i32
    return %c0_i32, %c0_i32_0 : i32, i32
  }
  func.func @transform_3(%arg0: i32) -> (i32, i32) {
    %c0_i32 = arith.constant 0 : i32
    %c0_i32_0 = arith.constant 0 : i32
    %c0_i32_1 = arith.constant 0 : i32
    return %c0_i32, %c0_i32_0 : i32, i32
  }
  func.func @transform_4(%arg0: i32) -> (i32, i32) {
    %c0_i32 = arith.constant 0 : i32
    %c0_i32_0 = arith.constant 0 : i32
    return %arg0, %c0_i32 : i32, i32
  }
  func.func @transform_5(%arg0: i32) -> (i32, i32) {
    %c0_i32 = arith.constant 0 : i32
    %c0_i32_0 = arith.constant 0 : i32
    return %arg0, %c0_i32 : i32, i32
  }
  func.func @transform_6(%arg0: i32) -> (i32, i32) {
    %c0_i32 = arith.constant 0 : i32
    %c0_i32_0 = arith.constant 0 : i32
    return %arg0, %c0_i32 : i32, i32
  }
}

module attributes {stable_mosaic.version = 11 : i64} {
  func.func @_gat_attn_kernel(%arg0: i32, %arg1: i32, %arg2: memref<1x16x1xf32, #tpu.memory_space<vmem>>, %arg3: memref<1x1x16xf32, #tpu.memory_space<vmem>>, %arg4: memref<16x16xbf16, #tpu.memory_space<vmem>>, %arg5: memref<1x16x4xbf16, #tpu.memory_space<vmem>>, %arg6: memref<1x4xf32, #tpu.memory_space<vmem>>, %arg7: memref<16x4xf32, #tpu.memory_space<vmem>>, %arg8: memref<1x16x1xf32, #tpu.memory_space<vmem>>, %arg9: memref<1x16x1xf32, #tpu.memory_space<vmem>>, %arg10: memref<1x16x4xf32, #tpu.memory_space<vmem>>) attributes {dimension_semantics = [#tpu.dimension_semantics<parallel>, #tpu.dimension_semantics<arbitrary>], iteration_bounds = array<i64: 1, 1>, scalar_prefetch = 0 : i64, scratch_operands = 3 : i64, tpu.core_type = #tpu.core_type<tc>, window_params = [{transform_indices = @transform_0, window_bounds = array<i64: 1, 16, 1>}, {transform_indices = @transform_1, window_bounds = array<i64: 1, 1, 16>}, {transform_indices = @transform_2, window_bounds = array<i64: 16, 16>}, {transform_indices = @transform_3, window_bounds = array<i64: 1, 16, 4>}, {pipeline_mode = #tpu.pipeline_mode<synchronous>, transform_indices = @transform_4, window_bounds = array<i64: 1, 4>}, {transform_indices = @transform_5, window_bounds = array<i64: 16, 4>}]} {
    %c0_i32 = arith.constant 0 : i32
    %0 = arith.cmpi eq, %arg1, %c0_i32 : i32
    %1 = arith.extui %0 : i1 to i32
    %c0_i32_0 = arith.constant 0 : i32
    %2 = arith.cmpi ne, %1, %c0_i32_0 : i32
    scf.if %2 {
      %cst_34 = arith.constant 0xFF800000 : f32
      %42 = vector.broadcast %cst_34 : f32 to vector<1x16x1xf32>
      %c0_35 = arith.constant 0 : index
      %c0_36 = arith.constant 0 : index
      %c0_37 = arith.constant 0 : index
      %43 = vector.load %arg8[%c0_35, %c0_36, %c0_37] : memref<1x16x1xf32, #tpu.memory_space<vmem>>, vector<1x16x1xf32>
      tpu.vector_store %arg8[%c0_35, %c0_36, %c0_37], %42 {strides = array<i32>} : memref<1x16x1xf32, #tpu.memory_space<vmem>>, vector<1x16x1xf32>,
      %cst_38 = arith.constant 0.000000e+00 : f32
      %44 = vector.broadcast %cst_38 : f32 to vector<1x16x1xf32>
      %c0_39 = arith.constant 0 : index
      %c0_40 = arith.constant 0 : index
      %c0_41 = arith.constant 0 : index
      %45 = vector.load %arg9[%c0_39, %c0_40, %c0_41] : memref<1x16x1xf32, #tpu.memory_space<vmem>>, vector<1x16x1xf32>
      tpu.vector_store %arg9[%c0_39, %c0_40, %c0_41], %44 {strides = array<i32>} : memref<1x16x1xf32, #tpu.memory_space<vmem>>, vector<1x16x1xf32>,
      %cst_42 = arith.constant 0.000000e+00 : f32
      %46 = vector.broadcast %cst_42 : f32 to vector<1x16x4xf32>
      %c0_43 = arith.constant 0 : index
      %c0_44 = arith.constant 0 : index
      %c0_45 = arith.constant 0 : index
      %47 = vector.load %arg10[%c0_43, %c0_44, %c0_45] : memref<1x16x4xf32, #tpu.memory_space<vmem>>, vector<1x16x4xf32>
      tpu.vector_store %arg10[%c0_43, %c0_44, %c0_45], %46 {strides = array<i32>} : memref<1x16x4xf32, #tpu.memory_space<vmem>>, vector<1x16x4xf32>,
    } else {
    }
    %c0 = arith.constant 0 : index
    %c0_1 = arith.constant 0 : index
    %c0_2 = arith.constant 0 : index
    %3 = vector.load %arg2[%c0, %c0_1, %c0_2] : memref<1x16x1xf32, #tpu.memory_space<vmem>>, vector<1x16x1xf32>
    %c0_3 = arith.constant 0 : index
    %c0_4 = arith.constant 0 : index
    %c0_5 = arith.constant 0 : index
    %4 = vector.load %arg3[%c0_3, %c0_4, %c0_5] : memref<1x1x16xf32, #tpu.memory_space<vmem>>, vector<1x1x16xf32>
    %5 = vector.broadcast %3 : vector<1x16x1xf32> to vector<1x16x16xf32>
    %6 = vector.broadcast %4 : vector<1x1x16xf32> to vector<1x16x16xf32>
    %7 = arith.addf %5, %6 : vector<1x16x16xf32>
    %cst = arith.constant 2.000000e-01 : f32
    %8 = vector.broadcast %cst : f32 to vector<1x16x16xf32>
    %9 = arith.mulf %8, %7 : vector<1x16x16xf32>
    %10 = arith.maximumf %7, %9 : vector<1x16x16xf32>
    %c0_6 = arith.constant 0 : index
    %c0_7 = arith.constant 0 : index
    %c0_8 = arith.constant 0 : index
    %11 = vector.load %arg8[%c0_6, %c0_7, %c0_8] : memref<1x16x1xf32, #tpu.memory_space<vmem>>, vector<1x16x1xf32>
    %cst_9 = arith.constant dense<0xFF800000> : vector<1x16xf32>
    %12 = vector.multi_reduction <maximumf>, %10, %cst_9 [2] : vector<1x16x16xf32> to vector<1x16xf32>
    %13 = vector.shape_cast %12 : vector<1x16xf32> to vector<1x16x1xf32>
    %14 = arith.maximumf %11, %13 : vector<1x16x1xf32>
    %15 = arith.subf %11, %14 : vector<1x16x1xf32>
    %16 = math.exp %15 : vector<1x16x1xf32>
    %17 = vector.broadcast %14 : vector<1x16x1xf32> to vector<1x16x16xf32>
    %18 = arith.subf %10, %17 : vector<1x16x16xf32>
    %19 = math.exp %18 : vector<1x16x16xf32>
    %c0_10 = arith.constant 0 : index
    %c0_11 = arith.constant 0 : index
    %20 = vector.load %arg4[%c0_10, %c0_11] : memref<16x16xbf16, #tpu.memory_space<vmem>>, vector<16x16xbf16>
    %21 = arith.extf %20 : vector<16x16xbf16> to vector<16x16xf32>
    %22 = vector.shape_cast %21 : vector<16x16xf32> to vector<1x16x16xf32>
    %23 = arith.mulf %19, %22 : vector<1x16x16xf32>
    %c0_12 = arith.constant 0 : index
    %c0_13 = arith.constant 0 : index
    %c0_14 = arith.constant 0 : index
    %24 = vector.load %arg9[%c0_12, %c0_13, %c0_14] : memref<1x16x1xf32, #tpu.memory_space<vmem>>, vector<1x16x1xf32>
    %25 = arith.mulf %16, %24 : vector<1x16x1xf32>
    %cst_15 = arith.constant dense<0.000000e+00> : vector<1x16xf32>
    %26 = vector.multi_reduction <add>, %23, %cst_15 [2] : vector<1x16x16xf32> to vector<1x16xf32>
    %27 = vector.shape_cast %26 : vector<1x16xf32> to vector<1x16x1xf32>
    %28 = arith.addf %25, %27 : vector<1x16x1xf32>
    %c0_16 = arith.constant 0 : index
    %c0_17 = arith.constant 0 : index
    %c0_18 = arith.constant 0 : index
    %29 = vector.load %arg9[%c0_16, %c0_17, %c0_18] : memref<1x16x1xf32, #tpu.memory_space<vmem>>, vector<1x16x1xf32>
    tpu.vector_store %arg9[%c0_16, %c0_17, %c0_18], %28 {strides = array<i32>} : memref<1x16x1xf32, #tpu.memory_space<vmem>>, vector<1x16x1xf32>,
    %c0_19 = arith.constant 0 : index
    %c0_20 = arith.constant 0 : index
    %c0_21 = arith.constant 0 : index
    %30 = vector.load %arg10[%c0_19, %c0_20, %c0_21] : memref<1x16x4xf32, #tpu.memory_space<vmem>>, vector<1x16x4xf32>
    %31 = vector.broadcast %16 : vector<1x16x1xf32> to vector<1x16x4xf32>
    %32 = arith.mulf %31, %30 : vector<1x16x4xf32>
    %33 = arith.truncf %23 : vector<1x16x16xf32> to vector<1x16x16xbf16>
    %c0_22 = arith.constant 0 : index
    %c0_23 = arith.constant 0 : index
    %c0_24 = arith.constant 0 : index
    %34 = vector.load %arg5[%c0_22, %c0_23, %c0_24] : memref<1x16x4xbf16, #tpu.memory_space<vmem>>, vector<1x16x4xbf16>
    "tpu.trace_start"() <{level = 10 : i32, message = "hts,hsc->htc"}> : () -> ()
    %cst_25 = arith.constant dense<0.000000e+00> : vector<1x16x4xf32>
    %35 = tpu.matmul %33, %34, %cst_25 {dimension_numbers = #tpu.dot_dimension_numbers<[2], [1], [1], [2], [0, 0, 0, 1, 1, 2], [0], [0]>} : vector<1x16x16xbf16>, vector<1x16x4xbf16>, vector<1x16x4xf32> -> vector<1x16x4xf32>
    "tpu.trace_stop"() : () -> ()
    %36 = arith.addf %32, %35 : vector<1x16x4xf32>
    %c0_26 = arith.constant 0 : index
    %c0_27 = arith.constant 0 : index
    %c0_28 = arith.constant 0 : index
    %37 = vector.load %arg10[%c0_26, %c0_27, %c0_28] : memref<1x16x4xf32, #tpu.memory_space<vmem>>, vector<1x16x4xf32>
    tpu.vector_store %arg10[%c0_26, %c0_27, %c0_28], %36 {strides = array<i32>} : memref<1x16x4xf32, #tpu.memory_space<vmem>>, vector<1x16x4xf32>,
    %c0_29 = arith.constant 0 : index
    %c0_30 = arith.constant 0 : index
    %c0_31 = arith.constant 0 : index
    %38 = vector.load %arg8[%c0_29, %c0_30, %c0_31] : memref<1x16x1xf32, #tpu.memory_space<vmem>>, vector<1x16x1xf32>
    tpu.vector_store %arg8[%c0_29, %c0_30, %c0_31], %14 {strides = array<i32>} : memref<1x16x1xf32, #tpu.memory_space<vmem>>, vector<1x16x1xf32>,
    %c0_i32_32 = arith.constant 0 : i32
    %39 = arith.cmpi eq, %arg1, %c0_i32_32 : i32
    %40 = arith.extui %39 : i1 to i32
    %c0_i32_33 = arith.constant 0 : i32
    %41 = arith.cmpi ne, %40, %c0_i32_33 : i32
    scf.if %41 {
      %c0_34 = arith.constant 0 : index
      %c0_35 = arith.constant 0 : index
      %c0_36 = arith.constant 0 : index
      %42 = vector.load %arg9[%c0_34, %c0_35, %c0_36] : memref<1x16x1xf32, #tpu.memory_space<vmem>>, vector<1x16x1xf32>
      %cst_37 = arith.constant 0.000000e+00 : f32
      %43 = vector.broadcast %cst_37 : f32 to vector<1x16x1xf32>
      %44 = arith.cmpf ogt, %42, %43 : vector<1x16x1xf32>
      %cst_38 = arith.constant 1.000000e+00 : f32
      %45 = vector.broadcast %cst_38 : f32 to vector<1x16x1xf32>
      %46 = arith.select %44, %42, %45 : vector<1x16x1xi1>, vector<1x16x1xf32>
      %47 = tpu.reciprocal %46 {approx = true} : vector<1x16x1xf32> -> vector<1x16x1xf32>
      %cst_39 = arith.constant 0.000000e+00 : f32
      %48 = vector.broadcast %cst_39 : f32 to vector<1x16x1xf32>
      %49 = arith.cmpf ogt, %42, %48 : vector<1x16x1xf32>
      %c0_40 = arith.constant 0 : index
      %c0_41 = arith.constant 0 : index
      %c0_42 = arith.constant 0 : index
      %50 = vector.load %arg10[%c0_40, %c0_41, %c0_42] : memref<1x16x4xf32, #tpu.memory_space<vmem>>, vector<1x16x4xf32>
      %51 = vector.broadcast %47 : vector<1x16x1xf32> to vector<1x16x4xf32>
      %52 = arith.mulf %50, %51 : vector<1x16x4xf32>
      %cst_43 = arith.constant 0.000000e+00 : f32
      %53 = vector.shape_cast %49 : vector<1x16x1xi1> to vector<1x16x1xi1>
      %54 = vector.broadcast %53 : vector<1x16x1xi1> to vector<1x16x4xi1>
      %55 = vector.broadcast %cst_43 : f32 to vector<1x16x4xf32>
      %56 = arith.select %54, %52, %55 : vector<1x16x4xi1>, vector<1x16x4xf32>
      %57 = vector.shape_cast %56 : vector<1x16x4xf32> to vector<16x4xf32>
      %c0_44 = arith.constant 0 : index
      %c0_45 = arith.constant 0 : index
      %58 = vector.load %arg6[%c0_44, %c0_45] : memref<1x4xf32, #tpu.memory_space<vmem>>, vector<1x4xf32>
      %59 = vector.broadcast %58 : vector<1x4xf32> to vector<16x4xf32>
      %60 = arith.addf %57, %59 : vector<16x4xf32>
      %c0_46 = arith.constant 0 : index
      %c0_47 = arith.constant 0 : index
      %61 = vector.load %arg7[%c0_46, %c0_47] : memref<16x4xf32, #tpu.memory_space<vmem>>, vector<16x4xf32>
      tpu.vector_store %arg7[%c0_46, %c0_47], %60 {strides = array<i32>} : memref<16x4xf32, #tpu.memory_space<vmem>>, vector<16x4xf32>,
    } else {
    }
    return
  }
  func.func @transform_0(%arg0: i32, %arg1: i32) -> (i32, i32, i32) {
    %c0_i32 = arith.constant 0 : i32
    %c0_i32_0 = arith.constant 0 : i32
    %c0_i32_1 = arith.constant 0 : i32
    return %c0_i32, %arg0, %c0_i32_0 : i32, i32, i32
  }
  func.func @transform_1(%arg0: i32, %arg1: i32) -> (i32, i32, i32) {
    %c0_i32 = arith.constant 0 : i32
    %c0_i32_0 = arith.constant 0 : i32
    %c0_i32_1 = arith.constant 0 : i32
    return %c0_i32, %c0_i32_0, %arg1 : i32, i32, i32
  }
  func.func @transform_2(%arg0: i32, %arg1: i32) -> (i32, i32) {
    %c0_i32 = arith.constant 0 : i32
    return %arg0, %arg1 : i32, i32
  }
  func.func @transform_3(%arg0: i32, %arg1: i32) -> (i32, i32, i32) {
    %c0_i32 = arith.constant 0 : i32
    %c0_i32_0 = arith.constant 0 : i32
    %c0_i32_1 = arith.constant 0 : i32
    return %c0_i32, %arg1, %c0_i32_0 : i32, i32, i32
  }
  func.func @transform_4(%arg0: i32, %arg1: i32) -> (i32, i32) {
    %c0_i32 = arith.constant 0 : i32
    %c0_i32_0 = arith.constant 0 : i32
    %c0_i32_1 = arith.constant 0 : i32
    return %c0_i32, %c0_i32_0 : i32, i32
  }
  func.func @transform_5(%arg0: i32, %arg1: i32) -> (i32, i32) {
    %c0_i32 = arith.constant 0 : i32
    %c0_i32_0 = arith.constant 0 : i32
    return %arg0, %c0_i32 : i32, i32
  }
}

</mosaic_0001>

<bundles_post_ra>
// kernel: gat_forward.6
= control target key start
LH: loop header
LB: loop body
LE: loop exit
PB: predicated region body
PF: predicated region fallthrough
CT: control target
= control target key end

     0   :  { %vm33_vm0 = vcmask 1043456   ;;  %vm29_vm1 = vcmask 64512   ;;  %vm53_vm2 = vcmask 257024   ;;  %s200_s29 = smov 112   ;;  %vm156_vm3 = vcmask 7168   ;;  %s300_s1 = inlined_call_operand.vmem [shape: bf16[8,32], index: 1, kind: input, shape index: {}]   ;;  %s301_s0 = inlined_call_operand.vmem [shape: bf16[16,8], index: 0, kind: input, shape index: {}]   ;;  %s302_s2 = inlined_call_operand.vmem [shape: f32[1,32], index: 2, kind: input, shape index: {}]   ;;  %s303_s3 = inlined_call_operand.vmem [shape: f32[1,32], index: 3, kind: input, shape index: {}]   ;;  %s304_s4 = inlined_call_operand.vmem [shape: bf16[16,32], index: 4, kind: output, shape index: {0}]   ;;  %s305_s6 = inlined_call_operand.vmem [shape: f32[16,4], index: 6, kind: output, shape index: {2}]   ;;  %s306_s5 = inlined_call_operand.vmem [shape: f32[16,4], index: 5, kind: output, shape index: {1}]  }
   0x1   :  { %v23_v0 = vld [vmem:[%s300_s1] sm:$0xf]  ;;  %s199_s1 = smov 104   ;;  %vm159_vm4 = vcmask 15360   ;;  %vm162_vm5 = vcmask 23552   ;;  %vm165_vm6 = vcmask 31744  }
   0x2   :  { %v35_v1 = vsel %vm33_vm0, %v23_v0, 0  ;;  %v193_v2 = vld [vmem:[%s301_s0] sm:$0xff]  ;;  %s201_s0 = smov 120  }
   0x3   :  { %44 = vmatpush.bf16.msra.mxu0 %v35_v1  ;;  %v197_v3 = vld [vmem:[%s302_s2] ss:$0 sm:$0xff] }
   0x4   :  { %v198_v7 = vld [vmem:[%s303_s3] ss:$0 sm:$0xff] }
   0x6   :  { %192 = vmatmul.msk.bf16.vlgmr.msra.gmra.mxu0 %vm29_vm1, %v193_v2 }
  0x83   :  { %v46_v4 = vpop.f32.mrf.mxu0 }
  0x84   :  { %v51_v5 = vpack.c.bf16 %v46_v4, %v46_v4  ;;  %v60_v6 = vmul.f32 %v197_v3, %v46_v4  ;;  %v66_v9 = vmul.f32 %v198_v7, %v46_v4 }
  0x86   :  { %54 = vst.msk [vmem:[%s304_s4] sm:$0xf] %vm53_vm2, %v51_v5  ;;  %132 = vrot.lane.b32.xlu0 %v60_v6, %s199_s1  ;;  %108 = vrot.lane.b32.xlu1 %v60_v6, %s200_s29  ;;  %v68_v13 = vsel %vm29_vm1, %v60_v6, 0.0  ;;  %v74_v14 = vsel %vm29_vm1, %v66_v9, 0.0 }
  0x87   :  { %82 = vrot.lane.b32.xlu2 %v60_v6, %s201_s0 }
  0x8b   :  { %v48_v8 = vpop.f32.mrf.mxu0 }
  0x8c   :  { %v52_v10 = vpack.c.bf16 %v48_v8, %v48_v8  ;;  %v61_v11 = vmul.f32 %v197_v3, %v48_v8  ;;  %v67_v12 = vmul.f32 %v198_v7, %v48_v8 }
  0x8e   :  { %55 = vst.msk [vmem:[%s304_s4 + $0x4] sm:$0xf] %vm53_vm2, %v52_v10  ;;  %144 = vrot.lane.b32.xlu1 %v66_v9, %s199_s1  ;;  %v77_v15 = vsel %vm29_vm1, %v67_v12, 0.0  ;;  %v71_v21 = vsel %vm29_vm1, %v61_v11, 0.0 }
  0x8f   :  { %96 = vrot.lane.b32.xlu2 %v66_v9, %s201_s0 }
  0x97   :  { %120 = vrot.lane.b32.xlu2 %v66_v9, %s200_s29 }
  0x9f   :  { %84 = vrot.lane.b32.xlu2 %v61_v11, %s201_s0 }
  0xa7   :  { %122 = vrot.lane.b32.xlu2 %v67_v12, %s200_s29 }
  0xaf   :  { %134 = vrot.lane.b32.xlu2 %v61_v11, %s199_s1 }
  0xb0   :  { %69 = vadd.xlane.f32.xlu0 %v68_v13 }
  0xb7   :  { %146 = vrot.lane.b32.xlu2 %v67_v12, %s199_s1 }
  0xb8   :  { %75 = vadd.xlane.f32.xlu1 %v74_v14 }
  0xc0   :  { %78 = vadd.xlane.f32.xlu1 %v77_v15 }
  0xc4   :  { %98 = vrot.lane.b32.xlu0 %v67_v12, %s201_s0 }
  0xcc   :  { %110 = vrot.lane.b32.xlu0 %v61_v11, %s200_s29 }
  0xe1   :  { %v83_v16 = vpop.permute.xlu2 %82 }
  0xe2   :  { %v88_v24 = vsel %vm29_vm1, %v83_v16, 0.0 }
  0xe9   :  { %v97_v17 = vpop.permute.xlu2 %96 }
  0xea   :  { %v102_v18 = vsel %vm29_vm1, %v97_v17, 0.0 }
  0xeb   :  { %103 = vadd.xlane.f32.xlu1 %v102_v18 }
  0xf1   :  { %v121_v19 = vpop.permute.xlu2 %120 }
  0xf2   :  { %v126_v20 = vsel %vm29_vm1, %v121_v19, 0.0 }
  0xf3   :  { %127 = vadd.xlane.f32.xlu2 %v126_v20 }
  0xf6   :  { %72 = vadd.xlane.f32.xlu0 %v71_v21 }
  0xf8   :  { %v109_v25 = vpop.permute.xlu1 %108  ;;  %v133_v31 = vpop.permute.xlu0 %132 }
  0xf9   :  { %v85_v22 = vpop.permute.xlu2 %84  ;;  %v114_v26 = vsel %vm29_vm1, %v109_v25, 0.0  ;;  %v138_v40 = vsel %vm29_vm1, %v133_v31, 0.0 }
  0xfa   :  { %v91_v23 = vsel %vm29_vm1, %v85_v22, 0.0 }
  0xfb   :  { %92 = vadd.xlane.f32.xlu1 %v91_v23 }
  0xfe   :  { %89 = vadd.xlane.f32.xlu0 %v88_v24 }
 0x100   :  { %v145_v29 = vpop.permute.xlu1 %144 }
 0x101   :  { %v123_v27 = vpop.permute.xlu2 %122  ;;  %v150_v30 = vsel %vm29_vm1, %v145_v29, 0.0 }
 0x102   :  { %v129_v28 = vsel %vm29_vm1, %v123_v27, 0.0 }
 0x106   :  { %115 = vadd.xlane.f32.xlu0 %v114_v26 }
 0x109   :  { %v135_v35 = vpop.permute.xlu2 %134 }
 0x10a   :  { %v141_v38 = vsel %vm29_vm1, %v135_v35, 0.0 }
 0x10e   :  { %130 = vadd.xlane.f32.xlu0 %v129_v28 }
 0x111   :  { %v147_v39 = vpop.permute.xlu2 %146 }
 0x112   :  { %v153_v41 = vsel %vm29_vm1, %v147_v39, 0.0 }
 0x116   :  { %151 = vadd.xlane.f32.xlu0 %v150_v30 }
 0x123   :  { %v70_v32 = vpop.xlane.xlu0 %69 }
 0x12b   :  { %v76_v45 = vpop.xlane.xlu1 %75 }
 0x133   :  { %v79_v48 = vpop.xlane.xlu1 %78 }
 0x136   :  { %v99_v33 = vpop.permute.xlu0 %98 }
 0x137   :  { %v105_v34 = vsel %vm29_vm1, %v99_v33, 0.0 }
 0x138   :  { %106 = vadd.xlane.f32.xlu2 %v105_v34 }
 0x13e   :  { %v111_v36 = vpop.permute.xlu0 %110 }
 0x13f   :  { %v117_v37 = vsel %vm29_vm1, %v111_v36, 0.0 }
 0x140   :  { %118 = vadd.xlane.f32.xlu1 %v117_v37  ;;  %142 = vadd.xlane.f32.xlu2 %v141_v38 }
 0x148   :  { %139 = vadd.xlane.f32.xlu1 %v138_v40  ;;  %154 = vadd.xlane.f32.xlu2 %v153_v41 }
 0x15e   :  { %v104_v50 = vpop.xlane.xlu1 %103 }
 0x15f   :  { %v168_v52 = vsel %vm156_vm3, %v76_v45, %v104_v50 }
 0x166   :  { %v128_v51 = vpop.xlane.xlu2 %127 }
 0x167   :  { %v170_v53 = vsel %vm159_vm4, %v168_v52, %v128_v51 }
 0x169   :  { %v73_v42 = vpop.xlane.xlu0 %72 }
 0x16e   :  { %v93_v56 = vpop.xlane.xlu1 %92 }
 0x16f   :  { %v158_v58 = vsel %vm156_vm3, %v73_v42, %v93_v56 }
 0x171   :  { %v90_v43 = vpop.xlane.xlu0 %89 }
 0x172   :  { %v157_v44 = vsel %vm156_vm3, %v70_v32, %v90_v43 }
 0x179   :  { %v116_v46 = vpop.xlane.xlu0 %115 }
 0x17a   :  { %v160_v47 = vsel %vm159_vm4, %v157_v44, %v116_v46 }
 0x181   :  { %v131_v49 = vpop.xlane.xlu0 %130 }
 0x189   :  { %v152_v54 = vpop.xlane.xlu0 %151 }
 0x18a   :  { %v172_v55 = vsel %vm162_vm5, %v170_v53, %v152_v54 }
 0x18b   :  { %174 = vst.msk [vmem:[%s305_s6] sm:$0xff] %vm165_vm6, %v172_v55 }
 0x1ab   :  { %v107_v57 = vpop.xlane.xlu2 %106 }
 0x1ac   :  { %v169_v63 = vsel %vm156_vm3, %v79_v48, %v107_v57 }
 0x1ad   :  { %v171_v2 = vsel %vm159_vm4, %v169_v63, %v131_v49 }
 0x1b3   :  { %v119_v59 = vpop.xlane.xlu1 %118  ;;  %v143_v60 = vpop.xlane.xlu2 %142 }
 0x1b4   :  { %v161_v61 = vsel %vm159_vm4, %v158_v58, %v119_v59 }
 0x1b5   :  { %v164_v62 = vsel %vm162_vm5, %v161_v61, %v143_v60 }
 0x1b6   :  { %167 = vst.msk [vmem:[%s306_s5 + $0x8] sm:$0xff] %vm165_vm6, %v164_v62 }
 0x1bb   :  { %v140_v0 = vpop.xlane.xlu1 %139  ;;  %v155_v1 = vpop.xlane.xlu2 %154 }
 0x1bc   :  { %v163_v3 = vsel %vm162_vm5, %v160_v47, %v140_v0  ;;  %v173_v4 = vsel %vm162_vm5, %v171_v2, %v155_v1 }
 0x1bd   :  { %166 = vst.msk [vmem:[%s306_s5] sm:$0xff] %vm165_vm6, %v163_v3 }
 0x1be   :  { %175 = vst.msk [vmem:[%s305_s6 + $0x8] sm:$0xff] %vm165_vm6, %v173_v4 }

// kernel: gat_forward.7
= control target key start
LH: loop header
LB: loop body
LE: loop exit
PB: predicated region body
PF: predicated region fallthrough
CT: control target
= control target key end

     0   :  { %v871_v0 = vmov 0   ;;  %vm25_vm0 = vcmask 7168   ;;  %v872_v9 = vmov -inf   ;;  %vm147_vm1 = vcmask 130048   ;;  %s875_s24 = smov 16   ;;  %s876_s25 = smov 24   ;;  %s1253_s0 = inlined_call_operand.vmem [shape: f32[4,16,1], index: 0, kind: input, shape index: {}]   ;;  %s1254_s1 = inlined_call_operand.vmem [shape: f32[4,1,16], index: 1, kind: input, shape index: {}]   ;;  %s1255_s3 = inlined_call_operand.vmem [shape: bf16[4,16,8], index: 3, kind: input, shape index: {}]   ;;  %s1256_s2 = inlined_call_operand.vmem [shape: bf16[16,16], index: 2, kind: input, shape index: {}]   ;;  %s1257_s4 = inlined_call_operand.vmem [shape: f32[1,32], index: 4, kind: input, shape index: {}]   ;;  %s1258_s5 = inlined_call_operand.vmem [shape: bf16[16,32], index: 5, kind: output, shape index: {}]  }
   0x1   :  { %808 = vset.pattern.permute.xlu1 %v871_v0  ;;  %807 = vset.pattern.permute.xlu0 %v871_v0  ;;  %v57_v1 = vld [vmem:[%s1253_s0 + $0x30] sm:$0xff]  ;;  %v55_v2 = vld [vmem:[%s1253_s0 + $0x20] sm:$0xff]  ;;  %v58_v4 = vld [vmem:[%s1253_s0 + $0x38] sm:$0xff]  ;;  %30 = vst.msk [vmem:[#allocation2 + $0x20] sm:$0xff] %vm25_vm0, %v872_v9  ;;  %v873_v43 = vmov 0.0   ;;  %vm42_vm2 = vcmask 64512  }
   0x2   :  { %95 = vperm.xlu1 %808, %v57_v1   ;;  %85 = vperm.xlu0 %807, %v55_v2   ;;  %v53_v3 = vld [vmem:[%s1253_s0 + $0x10] sm:$0xff]  ;;  %v56_v5 = vld [vmem:[%s1253_s0 + $0x28] sm:$0xff]  ;;  %v54_v6 = vld [vmem:[%s1253_s0 + $0x18] sm:$0xff]  ;;  %26 = vst.msk [vmem:[#allocation2] sm:$0xff] %vm25_vm0, %v872_v9 }
   0x3   :  { %809 = vset.pattern.permute.xlu2 %v871_v0  ;;  %v52_v7 = vld [vmem:[%s1253_s0 + $0x8] sm:$0xff]  ;;  %v51_v8 = vld [vmem:[%s1253_s0] sm:$0xff]  ;;  %27 = vst.msk [vmem:[#allocation2 + $0x8] sm:$0xff] %vm25_vm0, %v872_v9 }
   0x4   :  { %75 = vperm.xlu2 %809, %v53_v3   ;;  %28 = vst.msk [vmem:[#allocation2 + $0x10] sm:$0xff] %vm25_vm0, %v872_v9  ;;  %v810_v11 = vld [vmem:[%s1254_s1 + $0x3] ss:$0 sm:$0xff]  ;;  %v811_v12 = vld [vmem:[%s1254_s1 + $0x2] ss:$0 sm:$0xff] }
   0x5   :  { %29 = vst.msk [vmem:[#allocation2 + $0x18] sm:$0xff] %vm25_vm0, %v872_v9  ;;  %v812_v21 = vld [vmem:[%s1254_s1 + $0x1] ss:$0 sm:$0xff] }
   0x6   :  { %31 = vst.msk [vmem:[#allocation2 + $0x28] sm:$0xff] %vm25_vm0, %v872_v9 }
   0x7   :  { %32 = vst.msk [vmem:[#allocation2 + $0x30] sm:$0xff] %vm25_vm0, %v872_v9 }
   0x8   :  { %33 = vst.msk [vmem:[#allocation2 + $0x38] sm:$0xff] %vm25_vm0, %v872_v9  ;;  %v991_v45 = vld [vmem:[#allocation2 + $0x20] sm:$0xff] }
   0x9   :  { %34 = vst.msk [vmem:[#allocation3] sm:$0xff] %vm25_vm0, %v873_v43 }
   0xa   :  { %100 = vperm.xlu1 %808, %v58_v4   ;;  %90 = vperm.xlu0 %807, %v56_v5   ;;  %35 = vst.msk [vmem:[#allocation3 + $0x8] sm:$0xff] %vm25_vm0, %v873_v43 }
   0xb   :  { %36 = vst.msk [vmem:[#allocation3 + $0x10] sm:$0xff] %vm25_vm0, %v873_v43  ;;  %v1031_v62 = vld [vmem:[#allocation2 + $0x10] sm:$0xff] }
   0xc   :  { %80 = vperm.xlu2 %809, %v54_v6   ;;  %37 = vst.msk [vmem:[#allocation3 + $0x18] sm:$0xff] %vm25_vm0, %v873_v43  ;;  %v1033_v63 = vld [vmem:[#allocation2 + $0x18] sm:$0xff] }
   0xd   :  { %38 = vst.msk [vmem:[#allocation3 + $0x20] sm:$0xff] %vm25_vm0, %v873_v43  ;;  %v1013_v55 = vld [vmem:[#allocation2 + $0x28] sm:$0xff] }
   0xe   :  { %39 = vst.msk [vmem:[#allocation3 + $0x28] sm:$0xff] %vm25_vm0, %v873_v43  ;;  %v993_v46 = vld [vmem:[#allocation2 + $0x30] sm:$0xff] }
   0xf   :  { %40 = vst.msk [vmem:[#allocation3 + $0x30] sm:$0xff] %vm25_vm0, %v873_v43  ;;  %v1011_v54 = vld [vmem:[#allocation2 + $0x38] sm:$0xff] }
  0x10   :  { %41 = vst.msk [vmem:[#allocation3 + $0x38] sm:$0xff] %vm25_vm0, %v873_v43 }
  0x11   :  { %43 = vst.msk [vmem:[#allocation4] sm:$0xff] %vm42_vm2, %v873_v43 }
  0x12   :  { %70 = vperm.xlu1 %808, %v52_v7   ;;  %65 = vperm.xlu0 %807, %v51_v8   ;;  %v813_v7 = vld [vmem:[%s1254_s1] ss:$0 sm:$0xff]  ;;  %44 = vst.msk [vmem:[#allocation4 + $0x8] sm:$0xff] %vm42_vm2, %v873_v43 }
  0x13   :  { %45 = vst.msk [vmem:[#allocation4 + $0x10] sm:$0xff] %vm42_vm2, %v873_v43 }
  0x14   :  { %46 = vst.msk [vmem:[#allocation4 + $0x18] sm:$0xff] %vm42_vm2, %v873_v43 }
  0x15   :  { %47 = vst.msk [vmem:[#allocation4 + $0x20] sm:$0xff] %vm42_vm2, %v873_v43 }
  0x16   :  { %48 = vst.msk [vmem:[#allocation4 + $0x28] sm:$0xff] %vm42_vm2, %v873_v43 }
  0x17   :  { %49 = vst.msk [vmem:[#allocation4 + $0x30] sm:$0xff] %vm42_vm2, %v873_v43 }
  0x18   :  { %50 = vst.msk [vmem:[#allocation4 + $0x38] sm:$0xff] %vm42_vm2, %v873_v43 }
  0x5e   :  { %v76_v10 = vpop.permute.xlu2 %75 }
  0x5f   :  { %v117_v29 = vadd.f32 %v812_v21, %v76_v10 }
  0x61   :  { %v125_v34 = vmul.f32 0.2, %v117_v29 }
  0x63   :  { %v967_v39 = vmax.f32 %v117_v29, %v125_v34 }
  0x65   :  { %v154_v41 = vsel %vm147_vm1, %v967_v39, -inf }
  0x66   :  { %v81_v22 = vpop.permute.xlu2 %80 }
  0x67   :  { %v118_v30 = vadd.f32 %v812_v21, %v81_v22  ;;  %v796_v21 = vld [vmem:[%s1255_s3 + $0x18] sm:$0xff] }
  0x68   :  { %514 = vmatpush.bf16.msra.mxu3 %v796_v21 }
  0x69   :  { %v126_v36 = vmul.f32 0.2, %v118_v30 }
  0x6b   :  { %v969_v40 = vmax.f32 %v118_v30, %v126_v36 }
  0x6d   :  { %v157_v42 = vsel %vm147_vm1, %v969_v40, -inf }
  0x74   :  { %v96_v13 = vpop.permute.xlu1 %95  ;;  %v86_v14 = vpop.permute.xlu0 %85 }
  0x75   :  { %v121_v15 = vadd.f32 %v810_v11, %v96_v13  ;;  %v119_v16 = vadd.f32 %v811_v12, %v86_v14 }
  0x77   :  { %v129_v17 = vmul.f32 0.2, %v121_v15  ;;  %v127_v18 = vmul.f32 0.2, %v119_v16 }
  0x79   :  { %v948_v19 = vmax.f32 %v119_v16, %v127_v18  ;;  %v950_v20 = vmax.f32 %v121_v15, %v129_v17  ;;  %v795_v16 = vld [vmem:[%s1255_s3 + $0x10] sm:$0xff] }
  0x7a   :  { %486 = vmatpush.bf16.msra.mxu2 %v795_v16 }
  0x7b   :  { %v160_v23 = vsel %vm147_vm1, %v948_v19, -inf  ;;  %v166_v24 = vsel %vm147_vm1, %v950_v20, -inf }
  0x7c   :  { %v101_v25 = vpop.permute.xlu1 %100  ;;  %v91_v26 = vpop.permute.xlu0 %90  ;;  %161 = vmax.xlane.f32.xlu2 %v160_v23  ;;  %167 = vmax.xlane.f32.xlu1 %v166_v24  ;;  %v794_v23 = vld [vmem:[%s1255_s3 + $0x8] sm:$0xff] }
  0x7d   :  { %v122_v27 = vadd.f32 %v810_v11, %v101_v25  ;;  %v120_v28 = vadd.f32 %v811_v12, %v91_v26  ;;  %458 = vmatpush.bf16.msra.mxu1 %v794_v23 }
  0x7f   :  { %v130_v31 = vmul.f32 0.2, %v122_v27  ;;  %v128_v32 = vmul.f32 0.2, %v120_v28 }
  0x81   :  { %v959_v33 = vmax.f32 %v122_v27, %v130_v31  ;;  %v961_v35 = vmax.f32 %v120_v28, %v128_v32  ;;  %v798_v28 = vld [vmem:[%s1256_s2] sm:$0xff]  }
  0x82   :  { %v1077_v31 = vunpack.c.h.bf16 %v798_v28 }
  0x83   :  { %v169_v37 = vsel %vm147_vm1, %v959_v33, -inf  ;;  %v163_v38 = vsel %vm147_vm1, %v961_v35, -inf }
  0x84   :  { %170 = vmax.xlane.f32.xlu2 %v169_v37  ;;  %164 = vmax.xlane.f32.xlu0 %v163_v38  ;;  %v71_v44 = vpop.permute.xlu1 %70  ;;  %v66_v47 = vpop.permute.xlu0 %65 }
  0x85   :  { %v115_v8 = vadd.f32 %v813_v7, %v66_v47  ;;  %v116_v10 = vadd.f32 %v813_v7, %v71_v44 }
  0x87   :  { %v123_v9 = vmul.f32 0.2, %v115_v8  ;;  %v124_v12 = vmul.f32 0.2, %v116_v10 }
  0x89   :  { %v1054_v11 = vmax.f32 %v115_v8, %v123_v9  ;;  %v1058_v14 = vmax.f32 %v116_v10, %v124_v12 }
  0x8b   :  { %v148_v13 = vsel %vm147_vm1, %v1054_v11, -inf  ;;  %v151_v15 = vsel %vm147_vm1, %v1058_v14, -inf }
  0x8c   :  { %155 = vmax.xlane.f32.xlu2 %v154_v41  ;;  %158 = vmax.xlane.f32.xlu0 %v157_v42 }
  0xef   :  { %v162_v48 = vpop.xlane.xlu2 %161  ;;  %v168_v49 = vpop.xlane.xlu1 %167 }
  0xf0   :  { %v996_v50 = vmax.f32 %v991_v45, %v162_v48  ;;  %v999_v51 = vmax.f32 %v993_v46, %v168_v49 }
  0xf2   :  { %v184_v52 = vsub.f32 %v991_v45, %v996_v50  ;;  %542 = vst.msk [vmem:[#allocation2 + $0x20] sm:$0xff] %vm25_vm0, %v996_v50  ;;  %v186_v53 = vsub.f32 %v993_v46, %v999_v51  ;;  %226 = vperm.xlu1 %808, %v996_v50   ;;  %236 = vperm.xlu0 %807, %v999_v51  }
  0xf3   :  { %544 = vst.msk [vmem:[#allocation2 + $0x30] sm:$0xff] %vm25_vm0, %v999_v51 }
  0xf4   :  { %v200_v45 = vmul.f32 1.442695, %v186_v53 }
  0xf7   :  { %v171_v56 = vpop.xlane.xlu2 %170  ;;  %v165_v57 = vpop.xlane.xlu0 %164 }
  0xf8   :  { %v1016_v58 = vmax.f32 %v1011_v54, %v171_v56  ;;  %v1019_v59 = vmax.f32 %v1013_v55, %v165_v57 }
  0xfa   :  { %v187_v60 = vsub.f32 %v1011_v54, %v1016_v58  ;;  %545 = vst.msk [vmem:[#allocation2 + $0x38] sm:$0xff] %vm25_vm0, %v1016_v58  ;;  %v185_v61 = vsub.f32 %v1013_v55, %v1019_v59  ;;  %241 = vperm.xlu1 %808, %v1016_v58   ;;  %231 = vperm.xlu2 %809, %v1019_v59  }
  0xfb   :  { %543 = vst.msk [vmem:[#allocation2 + $0x28] sm:$0xff] %vm25_vm0, %v1019_v59 }
  0xff   :  { %v156_v1 = vpop.xlane.xlu2 %155  ;;  %v159_v2 = vpop.xlane.xlu0 %158 }
 0x100   :  { %v1036_v3 = vmax.f32 %v1031_v62, %v156_v1  ;;  %v1039_v4 = vmax.f32 %v1033_v63, %v159_v2 }
 0x102   :  { %v182_v5 = vsub.f32 %v1031_v62, %v1036_v3  ;;  %540 = vst.msk [vmem:[#allocation2 + $0x10] sm:$0xff] %vm25_vm0, %v1036_v3  ;;  %216 = vperm.xlu1 %808, %v1036_v3   ;;  %v183_v6 = vsub.f32 %v1033_v63, %v1039_v4  ;;  %v202_v62 = vmul.f32 1.442695, %v187_v60  ;;  %v196_v63 = vmul.f32 1.442695, %v184_v52 }
 0x103   :  { %541 = vst.msk [vmem:[#allocation2 + $0x18] sm:$0xff] %vm25_vm0, %v1039_v4 }
 0x10a   :  { %221 = vperm.xlu1 %808, %v1039_v4   ;;  %v198_v4 = vmul.f32 1.442695, %v185_v61  ;;  %v793_v61 = vld [vmem:[%s1255_s3] sm:$0xff]  ;;  %s874_s3 = smov 8  }
 0x10b   :  { %430 = vmatpush.bf16.msra.mxu0 %v793_v61  ;;  %v282_v61 = vld [vmem:[#allocation3 + $0x10] sm:$0xff] }
 0x11c   :  { %149 = vmax.xlane.f32.xlu0 %v148_v13 }
 0x123   :  { %152 = vmax.xlane.f32.xlu2 %v151_v15 }
 0x154   :  { %v232_v17 = vpop.permute.xlu2 %231 }
 0x155   :  { %v249_v18 = vsub.f32 %v961_v35, %v232_v17  ;;  %v1079_v35 = vunpack.c.l.bf16 %v798_v28 }
 0x157   :  { %v262_v22 = vmul.f32 1.442695, %v249_v18 }
 0x159   :  { %815 = vpow2.f32 %v262_v22 }
 0x15f   :  { %v816_v32 = vpop.eup %815 }
 0x160   :  { %v1082_v36 = vmul.f32 %v816_v32, %v1077_v31 }
 0x162   :  { %v398_v41 = vpack.c.bf16 %v1082_v36, %v1082_v36  ;;  %v311_v53 = vsel %vm147_vm1, %v1082_v36, 0.0 }
 0x164   :  { %v227_v24 = vpop.permute.xlu1 %226  ;;  %v237_v25 = vpop.permute.xlu0 %236  ;;  %v468_v49 = vunpack.c.l.b16 %v398_v41 }
 0x165   :  { %v248_v26 = vsub.f32 %v948_v19, %v227_v24  ;;  %v250_v27 = vsub.f32 %v950_v20, %v237_v25 }
 0x167   :  { %v260_v29 = vmul.f32 1.442695, %v248_v26  ;;  %v264_v30 = vmul.f32 1.442695, %v250_v27  ;;  %v139_v27 = vld [vmem:[#allocation2] sm:$0xff] }
 0x169   :  { %817 = vpow2.f32 %v260_v29 }
 0x16a   :  { %819 = vpow2.f32 %v264_v30 }
 0x16c   :  { %v242_v34 = vpop.permute.xlu1 %241 }
 0x16d   :  { %v251_v19 = vsub.f32 %v959_v33, %v242_v34  ;;  %v140_v34 = vld [vmem:[#allocation2 + $0x8] sm:$0xff] }
 0x16f   :  { %v818_v20 = vpop.eup %817  ;;  %v266_v37 = vmul.f32 1.442695, %v251_v19 }
 0x170   :  { %v1086_v38 = vmul.f32 %v818_v20, %v1079_v35  ;;  %v820_v42 = vpop.eup %819  ;;  %v192_v20 = vmul.f32 1.442695, %v182_v5 }
 0x171   :  { %821 = vpow2.f32 %v266_v37  ;;  %v1093_v56 = vmul.f32 %v820_v42, %v1079_v35  ;;  %v194_v42 = vmul.f32 1.442695, %v183_v6 }
 0x172   :  { %v397_v44 = vpack.c.bf16 %v1086_v38, %v1086_v38  ;;  %v308_v58 = vsel %vm147_vm1, %v1086_v38, 0.0 }
 0x173   :  { %v399_v8 = vpack.c.bf16 %v1093_v56, %v1093_v56  ;;  %v314_v60 = vsel %vm147_vm1, %v1093_v56, 0.0 }
 0x174   :  { %v217_v47 = vpop.permute.xlu1 %216  ;;  %v467_v48 = vunpack.c.l.b16 %v397_v44 }
 0x175   :  { %v246_v33 = vsub.f32 %v967_v39, %v217_v47  ;;  %v495_v12 = vunpack.c.l.b16 %v399_v8 }
 0x176   :  { %v469_v57 = vpack.c.b16 %v468_v49, %v467_v48 }
 0x177   :  { %v822_v1 = vpop.eup %821  ;;  %v256_v2 = vmul.f32 1.442695, %v246_v33  ;;  %v342_v33 = vld [vmem:[#allocation4 + $0x28] sm:$0xff] }
 0x178   :  { %785 = vmatmul.msk.bf16.vlgmr.msra.gmra.mxu2 %vm147_vm1, %v469_v57  ;;  %v1098_v7 = vmul.f32 %v822_v1, %v1077_v31 }
 0x179   :  { %823 = vpow2.f32 %v256_v2 }
 0x17a   :  { %v400_v9 = vpack.c.bf16 %v1098_v7, %v1098_v7  ;;  %v317_v59 = vsel %vm147_vm1, %v1098_v7, 0.0 }
 0x17c   :  { %v222_v10 = vpop.permute.xlu1 %221  ;;  %v496_v13 = vunpack.c.l.b16 %v400_v9 }
 0x17d   :  { %v247_v39 = vsub.f32 %v969_v40, %v222_v10 }
 0x17e   :  { %v497_v15 = vpack.c.b16 %v496_v13, %v495_v12 }
 0x17f   :  { %v258_v16 = vmul.f32 1.442695, %v247_v39  ;;  %v824_v17 = vpop.eup %823 }
 0x180   :  { %790 = vmatmul.msk.bf16.vlgmr.msra.gmra.mxu3 %vm147_vm1, %v497_v15  ;;  %v1107_v18 = vmul.f32 %v824_v17, %v1079_v35  ;;  %v340_v15 = vld [vmem:[#allocation4 + $0x18] sm:$0xff] }
 0x181   :  { %825 = vpow2.f32 %v258_v16  ;;  %v339_v16 = vld [vmem:[#allocation4 + $0x10] sm:$0xff] }
 0x182   :  { %v395_v23 = vpack.c.bf16 %v1107_v18, %v1107_v18  ;;  %v302_v51 = vsel %vm147_vm1, %v1107_v18, 0.0 }
 0x184   :  { %v439_v25 = vunpack.c.l.b16 %v395_v23 }
 0x187   :  { %v826_v21 = vpop.eup %825 }
 0x188   :  { %v275_v22 = vmul.f32 %v826_v21, %v1077_v31 }
 0x18a   :  { %v396_v24 = vpack.c.bf16 %v275_v22, %v275_v22  ;;  %v305_v46 = vsel %vm147_vm1, %v275_v22, 0.0 }
 0x18c   :  { %v440_v26 = vunpack.c.l.b16 %v396_v24 }
 0x18e   :  { %v441_v40 = vpack.c.b16 %v440_v26, %v439_v25 }
 0x18f   :  { %v150_v28 = vpop.xlane.xlu0 %149 }
 0x190   :  { %v172_v29 = vmax.f32 %v139_v27, %v150_v28  ;;  %780 = vmatmul.msk.bf16.vlgmr.msra.gmra.mxu1 %vm147_vm1, %v441_v40 }
 0x192   :  { %v180_v30 = vsub.f32 %v139_v27, %v172_v29  ;;  %538 = vst.msk [vmem:[#allocation2] sm:$0xff] %vm25_vm0, %v172_v29  ;;  %206 = vperm.xlu1 %808, %v172_v29   ;;  %v344_v29 = vld [vmem:[#allocation4 + $0x38] sm:$0xff] }
 0x194   :  { %v188_v32 = vmul.f32 1.442695, %v180_v30 }
 0x196   :  { %827 = vpow2.f32 %v188_v32  ;;  %v153_v19 = vpop.xlane.xlu2 %152 }
 0x197   :  { %v173_v37 = vmax.f32 %v140_v34, %v153_v19  ;;  %829 = vpow2.f32 %v192_v20  ;;  %v341_v19 = vld [vmem:[#allocation4 + $0x20] sm:$0xff] }
 0x199   :  { %v181_v41 = vsub.f32 %v140_v34, %v173_v37  ;;  %539 = vst.msk [vmem:[#allocation2 + $0x8] sm:$0xff] %vm25_vm0, %v173_v37 }
 0x19a   :  { %211 = vperm.xlu1 %808, %v173_v37  }
 0x19b   :  { %v190_v44 = vmul.f32 1.442695, %v181_v41 }
 0x19c   :  { %v1121_v47 = vpop.eup %827 }
 0x19d   :  { %831 = vpow2.f32 %v190_v44  ;;  %347 = vperm.xlu2 %809, %v1121_v47   ;;  %v1127_v3 = vpop.eup %829 }
 0x19e   :  { %833 = vpow2.f32 %v194_v42 }
 0x19f   :  { %835 = vpow2.f32 %v202_v62 }
 0x1a0   :  { %837 = vpow2.f32 %v196_v63  ;;  %v343_v63 = vld [vmem:[#allocation4 + $0x30] sm:$0xff] }
 0x1a1   :  { %839 = vpow2.f32 %v198_v4 }
 0x1a2   :  { %357 = vperm.xlu1 %808, %v1127_v3   ;;  %841 = vpow2.f32 %v200_v45 }
 0x1a3   :  { %v1136_v5 = vpop.eup %831 }
 0x1a4   :  { %v1138_v6 = vpop.eup %833  ;;  %352 = vperm.xlu0 %807, %v1136_v5  }
 0x1a5   :  { %362 = vperm.xlu2 %809, %v1138_v6   ;;  %v1142_v54 = vpop.eup %835 }
 0x1a6   :  { %v1148_v50 = vpop.eup %837 }
 0x1a7   :  { %v1150_v52 = vpop.eup %839 }
 0x1a8   :  { %v1154_v55 = vpop.eup %841 }
 0x1aa   :  { %382 = vperm.xlu1 %808, %v1142_v54  }
 0x1ac   :  { %367 = vperm.xlu0 %807, %v1148_v50  }
 0x1ad   :  { %372 = vperm.xlu2 %809, %v1150_v52  }
 0x1b4   :  { %377 = vperm.xlu0 %807, %v1154_v55  }
 0x1d6   :  { %306 = vadd.xlane.f32.xlu2 %v305_v46 }
 0x1de   :  { %303 = vadd.xlane.f32.xlu0 %v302_v51  ;;  %312 = vadd.xlane.f32.xlu2 %v311_v53  ;;  %v283_v51 = vld [vmem:[#allocation3 + $0x18] sm:$0xff] }
 0x1df   :  { %v291_v53 = vmul.f32 %v1138_v6, %v283_v51  ;;  %v337_v51 = vld [vmem:[#allocation4] sm:$0xff] }
 0x1e6   :  { %309 = vadd.xlane.f32.xlu0 %v308_v58  ;;  %318 = vadd.xlane.f32.xlu2 %v317_v59 }
 0x1ee   :  { %315 = vadd.xlane.f32.xlu0 %v314_v60  ;;  %v285_v60 = vld [vmem:[#allocation3 + $0x28] sm:$0xff] }
 0x1f7   :  { %v1184_v43 = vpop.permute.xlu2 %347 }
 0x1fb   :  { %v488_v36 = vpop.f32.mrf.mxu2 }
 0x1ff   :  { %v363_v48 = vpop.permute.xlu2 %362 }
 0x200   :  { %v388_v17 = vmul.f32 %v363_v48, %v340_v15  ;;  %v293_v48 = vmul.f32 %v1150_v52, %v285_v60  ;;  %v286_v15 = vld [vmem:[#allocation3 + $0x30] sm:$0xff] }
 0x203   :  { %v490_v7 = vpop.f32.mrf.mxu2  ;;  %v516_v18 = vpop.f32.mrf.mxu3 }
 0x204   :  { %v207_v49 = vpop.permute.xlu1 %206 }
 0x205   :  { %v244_v38 = vsub.f32 %v1054_v11, %v207_v49 }
 0x207   :  { %v252_v57 = vmul.f32 1.442695, %v244_v38  ;;  %v373_v1 = vpop.permute.xlu2 %372 }
 0x208   :  { %v390_v2 = vmul.f32 %v373_v1, %v342_v33 }
 0x209   :  { %843 = vpow2.f32 %v252_v57 }
 0x20a   :  { %v526_v56 = vadd.f32 %v490_v7, %v390_v2  ;;  %v287_v2 = vld [vmem:[#allocation3 + $0x38] sm:$0xff]  ;;  %v284_v7 = vld [vmem:[#allocation3 + $0x20] sm:$0xff] }
 0x20b   :  { %v518_v37 = vpop.f32.mrf.mxu3  ;;  %v292_v52 = vmul.f32 %v1148_v50, %v284_v7 }
 0x20c   :  { %535 = vst.msk [vmem:[#allocation4 + $0x28] sm:$0xff] %vm42_vm2, %v526_v56  ;;  %v212_v8 = vpop.permute.xlu1 %211  ;;  %v295_v56 = vmul.f32 %v1142_v54, %v287_v2  ;;  %v294_v54 = vmul.f32 %v1154_v55, %v286_v15 }
 0x20d   :  { %v245_v9 = vsub.f32 %v1058_v14, %v212_v8  ;;  %v460_v10 = vpop.f32.mrf.mxu1 }
 0x20f   :  { %v844_v12 = vpop.eup %843  ;;  %v254_v13 = vmul.f32 1.442695, %v245_v9 }
 0x210   :  { %v272_v39 = vmul.f32 %v844_v12, %v1079_v35 }
 0x211   :  { %845 = vpow2.f32 %v254_v13 }
 0x212   :  { %v296_v11 = vsel %vm147_vm1, %v272_v39, 0.0  ;;  %v393_v27 = vpack.c.bf16 %v272_v39, %v272_v39 }
 0x213   :  { %297 = vadd.xlane.f32.xlu1 %v296_v11 }
 0x214   :  { %v358_v21 = vpop.permute.xlu1 %357  ;;  %v411_v30 = vunpack.c.l.b16 %v393_v27 }
 0x215   :  { %v387_v22 = vmul.f32 %v358_v21, %v339_v16  ;;  %v462_v23 = vpop.f32.mrf.mxu1 }
 0x216   :  { %v524_v24 = vadd.f32 %v462_v23, %v388_v17  ;;  %v1194_v25 = vpop.permute.xlu0 %352 }
 0x217   :  { %v846_v14 = vpop.eup %845  ;;  %v523_v26 = vadd.f32 %v460_v10, %v387_v22 }
 0x218   :  { %533 = vst.msk [vmem:[#allocation4 + $0x18] sm:$0xff] %vm42_vm2, %v524_v24  ;;  %v273_v35 = vmul.f32 %v846_v14, %v1077_v31 }
 0x219   :  { %532 = vst.msk [vmem:[#allocation4 + $0x10] sm:$0xff] %vm42_vm2, %v523_v26 }
 0x21a   :  { %v299_v40 = vsel %vm147_vm1, %v273_v35, 0.0  ;;  %v394_v28 = vpack.c.bf16 %v273_v35, %v273_v35 }
 0x21b   :  { %300 = vadd.xlane.f32.xlu0 %v299_v40 }
 0x21c   :  { %v412_v32 = vunpack.c.l.b16 %v394_v28  ;;  %v383_v34 = vpop.permute.xlu1 %382 }
 0x21d   :  { %v392_v20 = vmul.f32 %v383_v34, %v344_v29 }
 0x21e   :  { %v368_v41 = vpop.permute.xlu0 %367  ;;  %v413_v42 = vpack.c.b16 %v412_v32, %v411_v30 }
 0x21f   :  { %v528_v44 = vadd.f32 %v518_v37, %v392_v20  ;;  %v389_v62 = vmul.f32 %v368_v41, %v341_v19  ;;  %v280_v20 = vld [vmem:[#allocation3] sm:$0xff] }
 0x220   :  { %775 = vmatmul.msk.bf16.vlgmr.msra.gmra.mxu0 %vm147_vm1, %v413_v42  ;;  %v288_v37 = vmul.f32 %v1121_v47, %v280_v20  ;;  %v814_v20 = vld [vmem:[%s1257_s4] ss:$0 sm:$0xff] }
 0x221   :  { %537 = vst.msk [vmem:[#allocation4 + $0x38] sm:$0xff] %vm42_vm2, %v528_v44  ;;  %v525_v31 = vadd.f32 %v488_v36, %v389_v62  ;;  %v290_v36 = vmul.f32 %v1127_v3, %v282_v61  ;;  %v281_v44 = vld [vmem:[#allocation3 + $0x8] sm:$0xff] }
 0x222   :  { %v289_v62 = vmul.f32 %v1136_v5, %v281_v44  ;;  %v385_v5 = vmul.f32 %v1184_v43, %v337_v51 }
 0x223   :  { %534 = vst.msk [vmem:[#allocation4 + $0x20] sm:$0xff] %vm42_vm2, %v525_v31 }
 0x226   :  { %v378_v4 = vpop.permute.xlu0 %377 }
 0x227   :  { %v391_v45 = vmul.f32 %v378_v4, %v343_v63 }
 0x229   :  { %v527_v46 = vadd.f32 %v516_v18, %v391_v45 }
 0x22a   :  { %v585_v15 = vld [vmem:[#allocation4 + $0x20] sm:$0xff] }
 0x22b   :  { %536 = vst.msk [vmem:[#allocation4 + $0x30] sm:$0xff] %vm42_vm2, %v527_v46 }
 0x249   :  { %v307_v58 = vpop.xlane.xlu2 %306 }
 0x24a   :  { %v323_v59 = vadd.f32 %v307_v58, %v291_v53 }
 0x24c   :  { %332 = vst.msk [vmem:[#allocation3 + $0x18] sm:$0xff] %vm25_vm0, %v323_v59 }
 0x251   :  { %v313_v49 = vpop.xlane.xlu2 %312  ;;  %v304_v38 = vpop.xlane.xlu0 %303 }
 0x252   :  { %v325_v33 = vadd.f32 %v313_v49, %v293_v48  ;;  %v322_v57 = vadd.f32 %v304_v38, %v290_v36  ;;  %v338_v48 = vld [vmem:[#allocation4 + $0x8] sm:$0xff] }
 0x253   :  { %v552_v1 = vld [vmem:[#allocation3 + $0x18] sm:$0xff]  ;;  %v386_v49 = vmul.f32 %v1194_v25, %v338_v48 }
 0x254   :  { %334 = vst.msk [vmem:[#allocation3 + $0x28] sm:$0xff] %vm25_vm0, %v325_v33  ;;  %vm560_vm3 = vcmp.gt.f32.partialorder %v552_v1, 0.0 }
 0x255   :  { %331 = vst.msk [vmem:[#allocation3 + $0x10] sm:$0xff] %vm25_vm0, %v322_v57  ;;  %v640_v6 = vsel %vm560_vm3, 1, %v871_v0  ;;  %v568_v39 = vsel %vm560_vm3, %v552_v1, 1.0  ;;  %v583_v1 = vld [vmem:[#allocation4 + $0x10] sm:$0xff] }
 0x256   :  { %655 = vperm.xlu1 %808, %v640_v6  }
 0x259   :  { %v319_v3 = vpop.xlane.xlu2 %318  ;;  %v310_v8 = vpop.xlane.xlu0 %309 }
 0x25a   :  { %v327_v9 = vadd.f32 %v319_v3, %v295_v56  ;;  %v324_v10 = vadd.f32 %v310_v8, %v292_v52  ;;  %v586_v52 = vld [vmem:[#allocation4 + $0x28] sm:$0xff] }
 0x25b   :  { %v554_v13 = vld [vmem:[#allocation3 + $0x28] sm:$0xff] }
 0x25c   :  { %336 = vst.msk [vmem:[#allocation3 + $0x38] sm:$0xff] %vm25_vm0, %v327_v9  ;;  %v551_v12 = vld [vmem:[#allocation3 + $0x10] sm:$0xff]  ;;  %vm562_vm5 = vcmp.gt.f32.partialorder %v554_v13, 0.0  ;;  %v584_v9 = vld [vmem:[#allocation4 + $0x18] sm:$0xff] }
 0x25d   :  { %333 = vst.msk [vmem:[#allocation3 + $0x20] sm:$0xff] %vm25_vm0, %v324_v10  ;;  %vm559_vm4 = vcmp.gt.f32.partialorder %v551_v12, 0.0  ;;  %v570_v18 = vsel %vm562_vm5, %v554_v13, 1.0  ;;  %v642_v19 = vsel %vm562_vm5, 1, %v871_v0 }
 0x25e   :  { %v639_v11 = vsel %vm559_vm4, 1, %v871_v0  ;;  %v567_v16 = vsel %vm559_vm4, %v551_v12, 1.0  ;;  %vm713_vm4 = vcmask 195584  }
 0x25f   :  { %652 = vperm.xlu0 %807, %v639_v11   ;;  %847 = vrcp.f32 %v567_v16 }
 0x260   :  { %849 = vrcp.f32 %v568_v39 }
 0x261   :  { %v316_v50 = vpop.xlane.xlu0 %315  ;;  %851 = vrcp.f32 %v570_v18  ;;  %v588_v18 = vld [vmem:[#allocation4 + $0x38] sm:$0xff] }
 0x262   :  { %v326_v17 = vadd.f32 %v316_v50, %v294_v54 }
 0x263   :  { %v556_v21 = vld [vmem:[#allocation3 + $0x38] sm:$0xff] }
 0x264   :  { %335 = vst.msk [vmem:[#allocation3 + $0x30] sm:$0xff] %vm25_vm0, %v326_v17  ;;  %v553_v22 = vld [vmem:[#allocation3 + $0x20] sm:$0xff]  ;;  %vm564_vm6 = vcmp.gt.f32.partialorder %v556_v21, 0.0  ;;  %v587_v17 = vld [vmem:[#allocation4 + $0x30] sm:$0xff] }
 0x265   :  { %v848_v23 = vpop.eup %847  ;;  %vm561_vm7 = vcmp.gt.f32.partialorder %v553_v22, 0.0  ;;  %v572_v24 = vsel %vm564_vm6, %v556_v21, 1.0  ;;  %v644_v32 = vsel %vm564_vm6, 1, %v871_v0 }
 0x266   :  { %v850_v14 = vpop.eup %849  ;;  %601 = vperm.xlu2 %809, %v848_v23   ;;  %v641_v26 = vsel %vm561_vm7, 1, %v871_v0  ;;  %v569_v27 = vsel %vm561_vm7, %v553_v22, 1.0  ;;  %853 = vrcp.f32 %v572_v24 }
 0x267   :  { %606 = vperm.xlu0 %807, %v850_v14   ;;  %658 = vperm.xlu1 %808, %v641_v26   ;;  %855 = vrcp.f32 %v569_v27  ;;  %v852_v55 = vpop.eup %851 }
 0x26b   :  { %v555_v35 = vld [vmem:[#allocation3 + $0x30] sm:$0xff] }
 0x26c   :  { %v854_v40 = vpop.eup %853  ;;  %vm563_vm8 = vcmp.gt.f32.partialorder %v555_v35, 0.0 }
 0x26d   :  { %v856_v28 = vpop.eup %855  ;;  %v571_v29 = vsel %vm563_vm8, %v555_v35, 1.0  ;;  %v643_v34 = vsel %vm563_vm8, 1, %v871_v0  ;;  %vm764_vm8 = vcmask 257024  }
 0x26e   :  { %616 = vperm.xlu2 %809, %v852_v55   ;;  %857 = vrcp.f32 %v571_v29 }
 0x26f   :  { %626 = vperm.xlu0 %807, %v854_v40   ;;  %611 = vperm.xlu1 %808, %v856_v28  }
 0x274   :  { %v858_v30 = vpop.eup %857 }
 0x276   :  { %621 = vperm.xlu2 %809, %v858_v30  }
 0x277   :  { %667 = vperm.xlu1 %808, %v644_v32   ;;  %664 = vperm.xlu0 %807, %v643_v34  }
 0x27e   :  { %661 = vperm.xlu2 %809, %v642_v19  }
 0x286   :  { %v298_v41 = vpop.xlane.xlu1 %297 }
 0x287   :  { %v320_v42 = vadd.f32 %v298_v41, %v288_v37 }
 0x289   :  { %329 = vst.msk [vmem:[#allocation3] sm:$0xff] %vm25_vm0, %v320_v42 }
 0x28e   :  { %v301_v31 = vpop.xlane.xlu0 %300 }
 0x28f   :  { %v321_v63 = vadd.f32 %v301_v31, %v289_v62 }
 0x290   :  { %v549_v4 = vld [vmem:[#allocation3] sm:$0xff] }
 0x291   :  { %330 = vst.msk [vmem:[#allocation3 + $0x8] sm:$0xff] %vm25_vm0, %v321_v63  ;;  %vm557_vm9 = vcmp.gt.f32.partialorder %v549_v4, 0.0 }
 0x292   :  { %v637_v45 = vsel %vm557_vm9, 1, %v871_v0  ;;  %v565_v53 = vsel %vm557_vm9, %v549_v4, 1.0 }
 0x293   :  { %646 = vperm.xlu1 %808, %v637_v45  }
 0x298   :  { %v550_v46 = vld [vmem:[#allocation3 + $0x8] sm:$0xff] }
 0x299   :  { %vm558_vm10 = vcmp.gt.f32.partialorder %v550_v46, 0.0 }
 0x29a   :  { %v638_v47 = vsel %vm558_vm10, 1, %v871_v0  ;;  %v566_v58 = vsel %vm558_vm10, %v550_v46, 1.0 }
 0x29b   :  { %649 = vperm.xlu2 %809, %v638_v47   ;;  %859 = vrcp.f32 %v566_v58 }
 0x29c   :  { %861 = vrcp.f32 %v565_v53 }
 0x29d   :  { %v432_v59 = vpop.f32.mrf.mxu0 }
 0x29e   :  { %v521_v60 = vadd.f32 %v432_v59, %v385_v5 }
 0x2a0   :  { %530 = vst.msk [vmem:[#allocation4] sm:$0xff] %vm42_vm2, %v521_v60 }
 0x2a1   :  { %v860_v61 = vpop.eup %859 }
 0x2a2   :  { %v862_v36 = vpop.eup %861  ;;  %596 = vperm.xlu0 %807, %v860_v61  }
 0x2a3   :  { %591 = vperm.xlu2 %809, %v862_v36  }
 0x2a5   :  { %v434_v38 = vpop.f32.mrf.mxu0 }
 0x2a6   :  { %v522_v33 = vadd.f32 %v434_v38, %v386_v49 }
 0x2a7   :  { %v581_v4 = vld [vmem:[#allocation4] sm:$0xff] }
 0x2a8   :  { %531 = vst.msk [vmem:[#allocation4 + $0x8] sm:$0xff] %vm42_vm2, %v522_v33 }
 0x2af   :  { %v582_v30 = vld [vmem:[#allocation4 + $0x8] sm:$0xff] }
 0x2c0   :  { %v602_v0 = vpop.permute.xlu2 %601 }
 0x2c1   :  { %v631_v6 = vmul.f32 %v602_v0, %v583_v1 }
 0x2c8   :  { %v617_v57 = vpop.permute.xlu2 %616  ;;  %v656_v2 = vpop.permute.xlu1 %655 }
 0x2c9   :  { %v634_v3 = vmul.f32 %v617_v57, %v586_v52  ;;  %vm672_vm13 = vcmp.eq.s32.totalorder %v656_v2, 1 }
 0x2d0   :  { %v622_v43 = vpop.permute.xlu2 %621 }
 0x2d1   :  { %v653_v7 = vpop.permute.xlu0 %652  ;;  %v635_v21 = vmul.f32 %v622_v43, %v587_v17 }
 0x2d2   :  { %vm671_vm11 = vcmp.eq.s32.totalorder %v653_v7, 1 }
 0x2d3   :  { %v679_v56 = vsel %vm671_vm11, %v631_v6, 0.0 }
 0x2d4   :  { %687 = vrot.lane.b32.xlu0 %v679_v56, %s874_s3 }
 0x2d8   :  { %v662_v8 = vpop.permute.xlu2 %661 }
 0x2d9   :  { %vm674_vm12 = vcmp.eq.s32.totalorder %v662_v8, 1  ;;  %v659_v25 = vpop.permute.xlu1 %658  ;;  %v607_v10 = vpop.permute.xlu0 %606 }
 0x2da   :  { %v682_v12 = vsel %vm674_vm12, %v634_v3, 0.0  ;;  %v632_v13 = vmul.f32 %v607_v10, %v584_v9  ;;  %vm673_vm14 = vcmp.eq.s32.totalorder %v659_v25, 1 }
 0x2dc   :  { %697 = vrot.lane.b32.xlu0 %v682_v12, %s875_s24  ;;  %v680_v39 = vsel %vm672_vm13, %v632_v13, 0.0 }
 0x2dd   :  { %689 = vrot.lane.b32.xlu1 %v680_v39, %s874_s3 }
 0x2e1   :  { %v612_v11 = vpop.permute.xlu1 %611  ;;  %v627_v16 = vpop.permute.xlu0 %626 }
 0x2e2   :  { %v633_v54 = vmul.f32 %v612_v11, %v585_v15  ;;  %v636_v22 = vmul.f32 %v627_v16, %v588_v18 }
 0x2e4   :  { %v681_v50 = vsel %vm673_vm14, %v633_v54, 0.0 }
 0x2e5   :  { %695 = vrot.lane.b32.xlu2 %v681_v50, %s875_s24 }
 0x2e9   :  { %v668_v23 = vpop.permute.xlu1 %667  ;;  %v665_v24 = vpop.permute.xlu0 %664 }
 0x2ea   :  { %vm676_vm15 = vcmp.eq.s32.totalorder %v668_v23, 1  ;;  %vm675_vm0 = vcmp.eq.s32.totalorder %v665_v24, 1 }
 0x2eb   :  { %v684_v14 = vsel %vm676_vm15, %v636_v22, 0.0  ;;  %v683_v26 = vsel %vm675_vm0, %v635_v21, 0.0 }
 0x2ec   :  { %703 = vrot.lane.b32.xlu1 %v683_v26, %s876_s25 }
 0x2ed   :  { %705 = vrot.lane.b32.xlu2 %v684_v14, %s876_s25 }
 0x2f5   :  { %v650_v27 = vpop.permute.xlu2 %649 }
 0x2f6   :  { %vm670_vm3 = vcmp.eq.s32.totalorder %v650_v27, 1 }
 0x2fd   :  { %v592_v35 = vpop.permute.xlu2 %591 }
 0x2fe   :  { %v629_v45 = vmul.f32 %v592_v35, %v581_v4 }
 0x305   :  { %v647_v28 = vpop.permute.xlu1 %646 }
 0x306   :  { %vm669_vm5 = vcmp.eq.s32.totalorder %v647_v28, 1 }
 0x307   :  { %v677_v46 = vsel %vm669_vm5, %v629_v45, 0.0 }
 0x314   :  { %v597_v55 = vpop.permute.xlu0 %596 }
 0x315   :  { %v630_v32 = vmul.f32 %v597_v55, %v582_v30 }
 0x317   :  { %v678_v34 = vsel %vm670_vm3, %v630_v32, 0.0 }
 0x33f   :  { %v696_v29 = vpop.permute.xlu2 %695 }
 0x346   :  { %v688_v40 = vpop.permute.xlu0 %687 }
 0x347   :  { %v706_v42 = vpop.permute.xlu2 %705  ;;  %v709_v51 = vsel %vm42_vm2, %v677_v46, %v688_v40 }
 0x348   :  { %v711_v58 = vsel %vm147_vm1, %v709_v51, %v696_v29 }
 0x34e   :  { %v698_v37 = vpop.permute.xlu0 %697 }
 0x34f   :  { %v690_v19 = vpop.permute.xlu1 %689 }
 0x350   :  { %v710_v41 = vsel %vm42_vm2, %v678_v34, %v690_v19 }
 0x351   :  { %v712_v44 = vsel %vm147_vm1, %v710_v41, %v698_v37 }
 0x352   :  { %v715_v62 = vsel %vm713_vm4, %v712_v44, %v706_v42 }
 0x353   :  { %v721_v31 = vadd.f32 %v814_v20, %v715_v62 }
 0x355   :  { %v792_v63 = vmul.f32 -1.442695, %v721_v31 }
 0x357   :  { %863 = vpow2.f32 %v792_v63 }
 0x35d   :  { %v864_v53 = vpop.eup %863 }
 0x35e   :  { %v704_v47 = vpop.permute.xlu1 %703  ;;  %v729_v5 = vadd.f32 1.0, %v864_v53 }
 0x35f   :  { %v714_v59 = vsel %vm713_vm4, %v711_v58, %v704_v47 }
 0x360   :  { %v720_v60 = vadd.f32 %v814_v20, %v714_v59  ;;  %865 = vrcp.f32 %v729_v5  ;;  %v756_v57 = vand.u32 2147483648, %v729_v5  ;;  %v754_v1 = vand.u32 2147483647, %v729_v5 }
 0x361   :  { %vm750_vm2 = vweird.f32 %v729_v5 }
 0x362   :  { %v791_v61 = vmul.f32 -1.442695, %v720_v60  ;;  %v757_v6 = vor.u32 1.1754944e-38, %v756_v57  ;;  %vm755_vm7 = vcmp.eq.f32.partialorder %v754_v1, 8.507059e+37 }
 0x364   :  { %867 = vpow2.f32 %v791_v61 }
 0x366   :  { %v866_v48 = vpop.eup %865 }
 0x367   :  { %v746_v36 = vmul.f32 %v866_v48, %v729_v5  ;;  %vm751_vm6 = vweird.f32 %v866_v48 }
 0x368   :  { %vm752_vm1 = vmor %vm750_vm2, %vm751_vm6 }
 0x369   :  { %v747_v49 = vsub.f32 1.0, %v746_v36 }
 0x36a   :  { %v868_v38 = vpop.eup %867 }
 0x36b   :  { %v728_v33 = vadd.f32 1.0, %v868_v38  ;;  %v748_v0 = vmul.f32 %v866_v48, %v747_v49 }
 0x36d   :  { %869 = vrcp.f32 %v728_v33  ;;  %v749_v43 = vadd.f32 %v866_v48, %v748_v0  ;;  %v741_v9 = vand.u32 2147483648, %v728_v33  ;;  %v739_v12 = vand.u32 2147483647, %v728_v33 }
 0x36e   :  { %vm735_vm10 = vweird.f32 %v728_v33 }
 0x36f   :  { %v753_v2 = vsel %vm752_vm1, %v866_v48, %v749_v43  ;;  %v742_v39 = vor.u32 1.1754944e-38, %v741_v9  ;;  %vm740_vm12 = vcmp.eq.f32.partialorder %v739_v12, 8.507059e+37 }
 0x370   :  { %v758_v7 = vsel %vm755_vm7, %v757_v6, %v753_v2 }
 0x371   :  { %v761_v56 = vmul.f32 %v758_v7, %v721_v31 }
 0x373   :  { %v870_v52 = vpop.eup %869  ;;  %v763_v8 = vpack.c.bf16 %v761_v56, %v761_v56 }
 0x374   :  { %v731_v3 = vmul.f32 %v870_v52, %v728_v33  ;;  %vm736_vm9 = vweird.f32 %v870_v52 }
 0x375   :  { %766 = vst.msk [vmem:[%s1258_s5 + $0x4] sm:$0xf] %vm764_vm8, %v763_v8  ;;  %vm737_vm11 = vmor %vm735_vm10, %vm736_vm9 }
 0x376   :  { %v732_v25 = vsub.f32 1.0, %v731_v3 }
 0x378   :  { %v733_v10 = vmul.f32 %v870_v52, %v732_v25 }
 0x37a   :  { %v734_v13 = vadd.f32 %v870_v52, %v733_v10 }
 0x37c   :  { %v738_v15 = vsel %vm737_vm11, %v870_v52, %v734_v13 }
 0x37d   :  { %v743_v11 = vsel %vm740_vm12, %v742_v39, %v738_v15 }
 0x37e   :  { %v760_v16 = vmul.f32 %v743_v11, %v720_v60 }
 0x380   :  { %v762_v54 = vpack.c.bf16 %v760_v16, %v760_v16 }
 0x382   :  { %765 = vst.msk [vmem:[%s1258_s5] sm:$0xf] %vm764_vm8, %v762_v54 }

// kernel: gat_forward.8
= control target key start
LH: loop header
LB: loop body
LE: loop exit
PB: predicated region body
PF: predicated region fallthrough
CT: control target
= control target key end

     0   :  { %vm44_vm0 = vcmask 261120   ;;  %vm64_vm1 = vcmask 257024   ;;  %s222_s7 = smov 112   ;;  %vm79_vm2 = vcmask 64512   ;;  %vm168_vm3 = vcmask 7168   ;;  %s324_s1 = inlined_call_operand.vmem [shape: bf16[32,32], index: 1, kind: input, shape index: {}]   ;;  %s325_s2 = inlined_call_operand.vmem [shape: f32[1,32], index: 2, kind: input, shape index: {}]   ;;  %s326_s3 = inlined_call_operand.vmem [shape: f32[1,32], index: 3, kind: input, shape index: {}]   ;;  %s327_s0 = inlined_call_operand.vmem [shape: bf16[16,32], index: 0, kind: input, shape index: {}]   ;;  %s328_s4 = inlined_call_operand.vmem [shape: bf16[16,32], index: 4, kind: output, shape index: {0}]   ;;  %s329_s6 = inlined_call_operand.vmem [shape: f32[16,4], index: 6, kind: output, shape index: {2}]   ;;  %s330_s5 = inlined_call_operand.vmem [shape: f32[16,4], index: 5, kind: output, shape index: {1}]  }
   0x1   :  { %v215_v0 = vld [vmem:[%s324_s1 + $0x8] sm:$0xff]  ;;  %v214_v1 = vld [vmem:[%s324_s1] sm:$0xff]  ;;  %s221_s1 = smov 104   ;;  %vm171_vm4 = vcmask 15360   ;;  %vm174_vm5 = vcmask 23552   ;;  %vm177_vm6 = vcmask 31744  }
   0x2   :  { %54 = vmatpush.bf16.msra.mxu0 %v215_v0  ;;  %v213_v2 = vld [vmem:[%s327_s0] sm:$0xff]  ;;  %s223_s0 = smov 120  }
   0x3   :  { %v219_v3 = vld [vmem:[%s325_s2] ss:$0 sm:$0xff] }
   0x4   :  { %v220_v7 = vld [vmem:[%s326_s3] ss:$0 sm:$0xff] }
   0x6   :  { %55 = vmatpush.bf16.msra.mxu0 %v214_v1 }
   0x9   :  { %212 = vmatmul.msk.bf16.vlgmr.msra.gmra.mxu0 %vm44_vm0, %v213_v2 }
  0x86   :  { %v57_v4 = vpop.f32.mrf.mxu0 }
  0x87   :  { %v62_v5 = vpack.c.bf16 %v57_v4, %v57_v4  ;;  %v71_v6 = vmul.f32 %v219_v3, %v57_v4  ;;  %v77_v9 = vmul.f32 %v220_v7, %v57_v4 }
  0x89   :  { %65 = vst.msk [vmem:[%s328_s4] sm:$0xf] %vm64_vm1, %v62_v5  ;;  %144 = vrot.lane.b32.xlu0 %v71_v6, %s221_s1  ;;  %120 = vrot.lane.b32.xlu1 %v71_v6, %s222_s7  ;;  %v80_v13 = vsel %vm79_vm2, %v71_v6, 0.0  ;;  %v86_v14 = vsel %vm79_vm2, %v77_v9, 0.0 }
  0x8a   :  { %94 = vrot.lane.b32.xlu2 %v71_v6, %s223_s0 }
  0x8e   :  { %v59_v8 = vpop.f32.mrf.mxu0 }
  0x8f   :  { %v63_v10 = vpack.c.bf16 %v59_v8, %v59_v8  ;;  %v72_v11 = vmul.f32 %v219_v3, %v59_v8  ;;  %v78_v12 = vmul.f32 %v220_v7, %v59_v8 }
  0x91   :  { %66 = vst.msk [vmem:[%s328_s4 + $0x4] sm:$0xf] %vm64_vm1, %v63_v10  ;;  %156 = vrot.lane.b32.xlu1 %v77_v9, %s221_s1  ;;  %v89_v15 = vsel %vm79_vm2, %v78_v12, 0.0  ;;  %v83_v21 = vsel %vm79_vm2, %v72_v11, 0.0 }
  0x92   :  { %108 = vrot.lane.b32.xlu2 %v77_v9, %s223_s0 }
  0x9a   :  { %132 = vrot.lane.b32.xlu2 %v77_v9, %s222_s7 }
  0xa2   :  { %96 = vrot.lane.b32.xlu2 %v72_v11, %s223_s0 }
  0xaa   :  { %134 = vrot.lane.b32.xlu2 %v78_v12, %s222_s7 }
  0xb2   :  { %146 = vrot.lane.b32.xlu2 %v72_v11, %s221_s1 }
  0xb3   :  { %81 = vadd.xlane.f32.xlu0 %v80_v13 }
  0xba   :  { %158 = vrot.lane.b32.xlu2 %v78_v12, %s221_s1 }
  0xbb   :  { %87 = vadd.xlane.f32.xlu1 %v86_v14 }
  0xc3   :  { %90 = vadd.xlane.f32.xlu1 %v89_v15 }
  0xc7   :  { %110 = vrot.lane.b32.xlu0 %v78_v12, %s223_s0 }
  0xcf   :  { %122 = vrot.lane.b32.xlu0 %v72_v11, %s222_s7 }
  0xe4   :  { %v95_v16 = vpop.permute.xlu2 %94 }
  0xe5   :  { %v100_v24 = vsel %vm79_vm2, %v95_v16, 0.0 }
  0xec   :  { %v109_v17 = vpop.permute.xlu2 %108 }
  0xed   :  { %v114_v18 = vsel %vm79_vm2, %v109_v17, 0.0 }
  0xee   :  { %115 = vadd.xlane.f32.xlu1 %v114_v18 }
  0xf4   :  { %v133_v19 = vpop.permute.xlu2 %132 }
  0xf5   :  { %v138_v20 = vsel %vm79_vm2, %v133_v19, 0.0 }
  0xf6   :  { %139 = vadd.xlane.f32.xlu2 %v138_v20 }
  0xf9   :  { %84 = vadd.xlane.f32.xlu0 %v83_v21 }
  0xfb   :  { %v121_v25 = vpop.permute.xlu1 %120  ;;  %v145_v31 = vpop.permute.xlu0 %144 }
  0xfc   :  { %v97_v22 = vpop.permute.xlu2 %96  ;;  %v126_v26 = vsel %vm79_vm2, %v121_v25, 0.0  ;;  %v150_v40 = vsel %vm79_vm2, %v145_v31, 0.0 }
  0xfd   :  { %v103_v23 = vsel %vm79_vm2, %v97_v22, 0.0 }
  0xfe   :  { %104 = vadd.xlane.f32.xlu1 %v103_v23 }
 0x101   :  { %101 = vadd.xlane.f32.xlu0 %v100_v24 }
 0x103   :  { %v157_v29 = vpop.permute.xlu1 %156 }
 0x104   :  { %v135_v27 = vpop.permute.xlu2 %134  ;;  %v162_v30 = vsel %vm79_vm2, %v157_v29, 0.0 }
 0x105   :  { %v141_v28 = vsel %vm79_vm2, %v135_v27, 0.0 }
 0x109   :  { %127 = vadd.xlane.f32.xlu0 %v126_v26 }
 0x10c   :  { %v147_v35 = vpop.permute.xlu2 %146 }
 0x10d   :  { %v153_v38 = vsel %vm79_vm2, %v147_v35, 0.0 }
 0x111   :  { %142 = vadd.xlane.f32.xlu0 %v141_v28 }
 0x114   :  { %v159_v39 = vpop.permute.xlu2 %158 }
 0x115   :  { %v165_v41 = vsel %vm79_vm2, %v159_v39, 0.0 }
 0x119   :  { %163 = vadd.xlane.f32.xlu0 %v162_v30 }
 0x126   :  { %v82_v32 = vpop.xlane.xlu0 %81 }
 0x12e   :  { %v88_v45 = vpop.xlane.xlu1 %87 }
 0x136   :  { %v91_v48 = vpop.xlane.xlu1 %90 }
 0x139   :  { %v111_v33 = vpop.permute.xlu0 %110 }
 0x13a   :  { %v117_v34 = vsel %vm79_vm2, %v111_v33, 0.0 }
 0x13b   :  { %118 = vadd.xlane.f32.xlu2 %v117_v34 }
 0x141   :  { %v123_v36 = vpop.permute.xlu0 %122 }
 0x142   :  { %v129_v37 = vsel %vm79_vm2, %v123_v36, 0.0 }
 0x143   :  { %130 = vadd.xlane.f32.xlu1 %v129_v37  ;;  %154 = vadd.xlane.f32.xlu2 %v153_v38 }
 0x14b   :  { %151 = vadd.xlane.f32.xlu1 %v150_v40  ;;  %166 = vadd.xlane.f32.xlu2 %v165_v41 }
 0x161   :  { %v116_v50 = vpop.xlane.xlu1 %115 }
 0x162   :  { %v180_v52 = vsel %vm168_vm3, %v88_v45, %v116_v50 }
 0x169   :  { %v140_v51 = vpop.xlane.xlu2 %139 }
 0x16a   :  { %v182_v53 = vsel %vm171_vm4, %v180_v52, %v140_v51 }
 0x16c   :  { %v85_v42 = vpop.xlane.xlu0 %84 }
 0x171   :  { %v105_v56 = vpop.xlane.xlu1 %104 }
 0x172   :  { %v170_v58 = vsel %vm168_vm3, %v85_v42, %v105_v56 }
 0x174   :  { %v102_v43 = vpop.xlane.xlu0 %101 }
 0x175   :  { %v169_v44 = vsel %vm168_vm3, %v82_v32, %v102_v43 }
 0x17c   :  { %v128_v46 = vpop.xlane.xlu0 %127 }
 0x17d   :  { %v172_v47 = vsel %vm171_vm4, %v169_v44, %v128_v46 }
 0x184   :  { %v143_v49 = vpop.xlane.xlu0 %142 }
 0x18c   :  { %v164_v54 = vpop.xlane.xlu0 %163 }
 0x18d   :  { %v184_v55 = vsel %vm174_vm5, %v182_v53, %v164_v54 }
 0x18e   :  { %186 = vst.msk [vmem:[%s329_s6] sm:$0xff] %vm177_vm6, %v184_v55 }
 0x1ae   :  { %v119_v57 = vpop.xlane.xlu2 %118 }
 0x1af   :  { %v181_v63 = vsel %vm168_vm3, %v91_v48, %v119_v57 }
 0x1b0   :  { %v183_v2 = vsel %vm171_vm4, %v181_v63, %v143_v49 }
 0x1b6   :  { %v131_v59 = vpop.xlane.xlu1 %130  ;;  %v155_v60 = vpop.xlane.xlu2 %154 }
 0x1b7   :  { %v173_v61 = vsel %vm171_vm4, %v170_v58, %v131_v59 }
 0x1b8   :  { %v176_v62 = vsel %vm174_vm5, %v173_v61, %v155_v60 }
 0x1b9   :  { %179 = vst.msk [vmem:[%s330_s5 + $0x8] sm:$0xff] %vm177_vm6, %v176_v62 }
 0x1be   :  { %v152_v0 = vpop.xlane.xlu1 %151  ;;  %v167_v1 = vpop.xlane.xlu2 %166 }
 0x1bf   :  { %v175_v3 = vsel %vm174_vm5, %v172_v47, %v152_v0  ;;  %v185_v4 = vsel %vm174_vm5, %v183_v2, %v167_v1 }
 0x1c0   :  { %178 = vst.msk [vmem:[%s330_s5] sm:$0xff] %vm177_vm6, %v175_v3 }
 0x1c1   :  { %187 = vst.msk [vmem:[%s329_s6 + $0x8] sm:$0xff] %vm177_vm6, %v185_v4 }

// kernel: gat_forward.10
= control target key start
LH: loop header
LB: loop body
LE: loop exit
PB: predicated region body
PF: predicated region fallthrough
CT: control target
= control target key end

     0   :  { %vm44_vm0 = vcmask 261120   ;;  %vm64_vm1 = vcmask 27648   ;;  %vm79_vm2 = vcmask 31744   ;;  %vm92_vm3 = vcmask 7168   ;;  %s195_s1 = inlined_call_operand.vmem [shape: bf16[32,4], index: 1, kind: input, shape index: {}]   ;;  %s196_s0 = inlined_call_operand.vmem [shape: bf16[16,32], index: 0, kind: input, shape index: {}]   ;;  %s197_s3 = inlined_call_operand.vmem [shape: f32[1,4], index: 3, kind: input, shape index: {}]   ;;  %s198_s2 = inlined_call_operand.vmem [shape: f32[1,4], index: 2, kind: input, shape index: {}]   ;;  %s199_s4 = inlined_call_operand.vmem [shape: bf16[16,4], index: 4, kind: output, shape index: {0}]   ;;  %s200_s6 = inlined_call_operand.vmem [shape: f32[16,1], index: 6, kind: output, shape index: {2}]   ;;  %s201_s5 = inlined_call_operand.vmem [shape: f32[16,1], index: 5, kind: output, shape index: {1}]  }
   0x1   :  { %v124_v0 = vld [vmem:[%s195_s1 + $0x8] sm:$0xff]  ;;  %v123_v1 = vld [vmem:[%s195_s1] sm:$0xff] }
   0x2   :  { %54 = vmatpush.bf16.msra.mxu0 %v124_v0  ;;  %v122_v2 = vld [vmem:[%s196_s0] sm:$0xff] }
   0x3   :  { %v125_v3 = vld [vmem:[%s197_s3] ss:$0 sm:$0xff] }
   0x4   :  { %v126_v4 = vld [vmem:[%s198_s2] ss:$0 sm:$0xff] }
   0x6   :  { %55 = vmatpush.bf16.msra.mxu0 %v123_v1 }
   0x9   :  { %121 = vmatmul.msk.bf16.vlgmr.msra.gmra.mxu0 %vm44_vm0, %v122_v2 }
  0x86   :  { %v57_v5 = vpop.f32.mrf.mxu0 }
  0x87   :  { %v62_v6 = vpack.c.bf16 %v57_v5, %v57_v5  ;;  %v77_v7 = vmul.f32 %v125_v3, %v57_v5  ;;  %v71_v8 = vmul.f32 %v126_v4, %v57_v5 }
  0x89   :  { %65 = vst.msk [vmem:[%s199_s4] sm:$0xf] %vm64_vm1, %v62_v6  ;;  %v86_v9 = vsel %vm79_vm2, %v77_v7, 0.0  ;;  %v80_v10 = vsel %vm79_vm2, %v71_v8, 0.0 }
  0x8a   :  { %87 = vadd.xlane.f32.xlu1 %v86_v9  ;;  %81 = vadd.xlane.f32.xlu0 %v80_v10 }
  0x8e   :  { %v59_v11 = vpop.f32.mrf.mxu0 }
  0x8f   :  { %v63_v12 = vpack.c.bf16 %v59_v11, %v59_v11  ;;  %v72_v13 = vmul.f32 %v126_v4, %v59_v11  ;;  %v78_v14 = vmul.f32 %v125_v3, %v59_v11 }
  0x91   :  { %66 = vst.msk [vmem:[%s199_s4 + $0x4] sm:$0xf] %vm64_vm1, %v63_v12  ;;  %v89_v15 = vsel %vm79_vm2, %v78_v14, 0.0  ;;  %v83_v16 = vsel %vm79_vm2, %v72_v13, 0.0 }
  0x92   :  { %90 = vadd.xlane.f32.xlu1 %v89_v15  ;;  %84 = vadd.xlane.f32.xlu0 %v83_v16 }
  0xfd   :  { %v88_v17 = vpop.xlane.xlu1 %87  ;;  %v82_v18 = vpop.xlane.xlu0 %81 }
  0xfe   :  { %95 = vst.msk [vmem:[%s200_s6] sm:$0xff] %vm92_vm3, %v88_v17 }
  0xff   :  { %93 = vst.msk [vmem:[%s201_s5] sm:$0xff] %vm92_vm3, %v82_v18 }
 0x105   :  { %v91_v19 = vpop.xlane.xlu1 %90  ;;  %v85_v20 = vpop.xlane.xlu0 %84 }
 0x106   :  { %96 = vst.msk [vmem:[%s200_s6 + $0x8] sm:$0xff] %vm92_vm3, %v91_v19 }
 0x107   :  { %94 = vst.msk [vmem:[%s201_s5 + $0x8] sm:$0xff] %vm92_vm3, %v85_v20 }

// kernel: gat_forward.11
= control target key start
LH: loop header
LB: loop body
LE: loop exit
PB: predicated region body
PF: predicated region fallthrough
CT: control target
= control target key end

     0   :  { %v241_v0 = vmov 0   ;;  %vm25_vm0 = vcmask 7168   ;;  %v242_v3 = vmov -inf   ;;  %vm57_vm1 = vcmask 130048   ;;  %s322_s0 = inlined_call_operand.vmem [shape: f32[1,16,1], index: 0, kind: input, shape index: {}]   ;;  %s323_s1 = inlined_call_operand.vmem [shape: f32[1,1,16], index: 1, kind: input, shape index: {}]   ;;  %s324_s3 = inlined_call_operand.vmem [shape: bf16[1,16,4], index: 3, kind: input, shape index: {}]   ;;  %s325_s2 = inlined_call_operand.vmem [shape: bf16[16,16], index: 2, kind: input, shape index: {}]   ;;  %s326_s4 = inlined_call_operand.vmem [shape: f32[1,4], index: 4, kind: input, shape index: {}]   ;;  %s327_s5 = inlined_call_operand.vmem [shape: f32[16,4], index: 5, kind: output, shape index: {}]  }
   0x1   :  { %224 = vset.pattern.permute.xlu0 %v241_v0  ;;  %v33_v1 = vld [vmem:[%s322_s0] sm:$0xff]  ;;  %225 = vset.pattern.permute.xlu2 %v241_v0  ;;  %v34_v2 = vld [vmem:[%s322_s0 + $0x8] sm:$0xff]  ;;  %26 = vst.msk [vmem:[#allocation2] sm:$0xff] %vm25_vm0, %v242_v3  ;;  %v243_v15 = vmov 0.0   ;;  %vm30_vm2 = vcmask 31744  }
   0x2   :  { %38 = vperm.xlu0 %224, %v33_v1   ;;  %226 = vset.pattern.permute.xlu1 %v241_v0  ;;  %27 = vst.msk [vmem:[#allocation2 + $0x8] sm:$0xff] %vm25_vm0, %v242_v3  ;;  %v227_v4 = vld [vmem:[%s323_s1] ss:$0 sm:$0xff] }
   0x3   :  { %28 = vst.msk [vmem:[#allocation3] sm:$0xff] %vm25_vm0, %v243_v15  ;;  %v216_v26 = vld [vmem:[%s324_s3] sm:$0xff] }
   0x4   :  { %29 = vst.msk [vmem:[#allocation3 + $0x8] sm:$0xff] %vm25_vm0, %v243_v15  ;;  %148 = vmatpush.bf16.msra.mxu0 %v216_v26  ;;  %v218_v30 = vld [vmem:[%s325_s2] sm:$0xff]  }
   0x5   :  { %31 = vst.msk [vmem:[#allocation4] sm:$0xff] %vm30_vm2, %v243_v15  ;;  %v219_v32 = vunpack.c.l.bf16 %v218_v30  ;;  %v220_v38 = vunpack.c.h.bf16 %v218_v30 }
   0x6   :  { %32 = vst.msk [vmem:[#allocation4 + $0x8] sm:$0xff] %vm30_vm2, %v243_v15 }
   0x8   :  { %v55_v16 = vld [vmem:[#allocation2] sm:$0xff] }
   0x9   :  { %v56_v20 = vld [vmem:[#allocation2 + $0x8] sm:$0xff] }
   0xa   :  { %43 = vperm.xlu0 %224, %v34_v2   ;;  %v94_v49 = vld [vmem:[#allocation3] sm:$0xff] }
   0xb   :  { %v95_v53 = vld [vmem:[#allocation3 + $0x8] sm:$0xff] }
   0xc   :  { %v109_v62 = vld [vmem:[#allocation4] sm:$0xff] }
  0x74   :  { %v39_v5 = vpop.permute.xlu0 %38 }
  0x75   :  { %v49_v6 = vadd.f32 %v227_v4, %v39_v5 }
  0x77   :  { %v51_v7 = vmul.f32 0.2, %v49_v6 }
  0x79   :  { %v53_v8 = vmax.f32 %v49_v6, %v51_v7  ;;  %v110_v6 = vld [vmem:[#allocation4 + $0x8] sm:$0xff] }
  0x7b   :  { %v58_v9 = vsel %vm57_vm1, %v53_v8, -inf }
  0x7c   :  { %59 = vmax.xlane.f32.xlu1 %v58_v9  ;;  %v44_v10 = vpop.permute.xlu0 %43 }
  0x7d   :  { %v50_v11 = vadd.f32 %v227_v4, %v44_v10 }
  0x7f   :  { %v52_v12 = vmul.f32 0.2, %v50_v11 }
  0x81   :  { %v54_v13 = vmax.f32 %v50_v11, %v52_v12 }
  0x83   :  { %v61_v14 = vsel %vm57_vm1, %v54_v13, -inf }
  0x84   :  { %62 = vmax.xlane.f32.xlu1 %v61_v14  ;;  %v228_v14 = vld [vmem:[%s326_s4] ss:$0 sm:$0xff] }
  0xef   :  { %v60_v17 = vpop.xlane.xlu1 %59 }
  0xf0   :  { %v64_v18 = vmax.f32 %v55_v16, %v60_v17 }
  0xf2   :  { %160 = vst.msk [vmem:[#allocation2] sm:$0xff] %vm25_vm0, %v64_v18  ;;  %74 = vperm.xlu2 %225, %v64_v18   ;;  %v66_v19 = vsub.f32 %v55_v16, %v64_v18 }
  0xf4   :  { %v68_v21 = vmul.f32 1.442695, %v66_v19 }
  0xf6   :  { %229 = vpow2.f32 %v68_v21 }
  0xf7   :  { %v63_v22 = vpop.xlane.xlu1 %62 }
  0xf8   :  { %v65_v23 = vmax.f32 %v56_v20, %v63_v22 }
  0xfa   :  { %v67_v24 = vsub.f32 %v56_v20, %v65_v23  ;;  %161 = vst.msk [vmem:[#allocation2 + $0x8] sm:$0xff] %vm25_vm0, %v65_v23  ;;  %79 = vperm.xlu2 %225, %v65_v23  }
  0xfc   :  { %v230_v25 = vpop.eup %229  ;;  %v70_v47 = vmul.f32 1.442695, %v67_v24 }
  0xfd   :  { %v96_v50 = vmul.f32 %v230_v25, %v94_v49 }
 0x102   :  { %113 = vperm.xlu2 %225, %v230_v25  }
 0x14c   :  { %v75_v27 = vpop.permute.xlu2 %74 }
 0x14d   :  { %v82_v28 = vsub.f32 %v53_v8, %v75_v27 }
 0x14f   :  { %v84_v29 = vmul.f32 1.442695, %v82_v28 }
 0x151   :  { %231 = vpow2.f32 %v84_v29 }
 0x154   :  { %v80_v31 = vpop.permute.xlu2 %79 }
 0x155   :  { %v83_v33 = vsub.f32 %v54_v13, %v80_v31 }
 0x157   :  { %v232_v34 = vpop.eup %231  ;;  %v86_v35 = vmul.f32 1.442695, %v83_v33 }
 0x158   :  { %v92_v36 = vmul.f32 %v232_v34, %v219_v32 }
 0x159   :  { %233 = vpow2.f32 %v86_v35 }
 0x15a   :  { %v98_v37 = vsel %vm57_vm1, %v92_v36, 0.0  ;;  %v123_v40 = vpack.c.bf16 %v92_v36, %v92_v36  ;;  %235 = vpow2.f32 %v70_v47 }
 0x15b   :  { %99 = vadd.xlane.f32.xlu0 %v98_v37 }
 0x15c   :  { %v129_v44 = vunpack.c.l.b16 %v123_v40  ;;  %v114_v63 = vpop.permute.xlu2 %113 }
 0x15d   :  { %v121_v2 = vmul.f32 %v114_v63, %v109_v62 }
 0x15f   :  { %v234_v39 = vpop.eup %233 }
 0x160   :  { %v93_v41 = vmul.f32 %v234_v39, %v220_v38  ;;  %v236_v48 = vpop.eup %235 }
 0x161   :  { %v97_v54 = vmul.f32 %v236_v48, %v95_v53 }
 0x162   :  { %v101_v42 = vsel %vm57_vm1, %v93_v41, 0.0  ;;  %v124_v43 = vpack.c.bf16 %v93_v41, %v93_v41 }
 0x163   :  { %102 = vadd.xlane.f32.xlu1 %v101_v42 }
 0x164   :  { %v130_v45 = vunpack.c.l.b16 %v124_v43 }
 0x166   :  { %v131_v46 = vpack.c.b16 %v130_v45, %v129_v44 }
 0x168   :  { %215 = vmatmul.msk.bf16.vlgmr.msra.gmra.mxu0 %vm57_vm1, %v131_v46 }
 0x17c   :  { %118 = vperm.xlu1 %226, %v236_v48  }
 0x1ce   :  { %v100_v51 = vpop.xlane.xlu0 %99 }
 0x1cf   :  { %v104_v52 = vadd.f32 %v100_v51, %v96_v50 }
 0x1d1   :  { %107 = vst.msk [vmem:[#allocation3] sm:$0xff] %vm25_vm0, %v104_v52 }
 0x1d6   :  { %v103_v55 = vpop.xlane.xlu1 %102 }
 0x1d7   :  { %v105_v56 = vadd.f32 %v103_v55, %v97_v54 }
 0x1d8   :  { %v165_v57 = vld [vmem:[#allocation3] sm:$0xff] }
 0x1d9   :  { %108 = vst.msk [vmem:[#allocation3 + $0x8] sm:$0xff] %vm25_vm0, %v105_v56  ;;  %vm167_vm3 = vcmp.gt.f32.partialorder %v165_v57, 0.0 }
 0x1da   :  { %v187_v58 = vsel %vm167_vm3, 1, %v241_v0  ;;  %v169_v59 = vsel %vm167_vm3, %v165_v57, 1.0 }
 0x1db   :  { %190 = vperm.xlu2 %225, %v187_v58   ;;  %237 = vrcp.f32 %v169_v59 }
 0x1e0   :  { %v166_v60 = vld [vmem:[#allocation3 + $0x8] sm:$0xff] }
 0x1e1   :  { %v238_v61 = vpop.eup %237  ;;  %vm168_vm4 = vcmp.gt.f32.partialorder %v166_v60, 0.0 }
 0x1e2   :  { %v170_v1 = vsel %vm168_vm4, %v166_v60, 1.0  ;;  %v188_v11 = vsel %vm168_vm4, 1, %v241_v0 }
 0x1e3   :  { %177 = vperm.xlu2 %225, %v238_v61   ;;  %239 = vrcp.f32 %v170_v1 }
 0x1e5   :  { %v150_v3 = vpop.f32.mrf.mxu0 }
 0x1e6   :  { %v155_v4 = vadd.f32 %v150_v3, %v121_v2 }
 0x1e8   :  { %158 = vst.msk [vmem:[#allocation4] sm:$0xff] %vm30_vm2, %v155_v4 }
 0x1e9   :  { %v240_v5 = vpop.eup %239 }
 0x1eb   :  { %182 = vperm.xlu2 %225, %v240_v5  }
 0x1ed   :  { %v152_v9 = vpop.f32.mrf.mxu0 }
 0x1ee   :  { %v119_v7 = vpop.permute.xlu1 %118 }
 0x1ef   :  { %v122_v8 = vmul.f32 %v119_v7, %v110_v6  ;;  %v173_v13 = vld [vmem:[#allocation4] sm:$0xff] }
 0x1f1   :  { %v156_v10 = vadd.f32 %v152_v9, %v122_v8 }
 0x1f3   :  { %159 = vst.msk [vmem:[#allocation4 + $0x8] sm:$0xff] %vm30_vm2, %v156_v10  ;;  %193 = vperm.xlu2 %225, %v188_v11  }
 0x1fa   :  { %v174_v19 = vld [vmem:[#allocation4 + $0x8] sm:$0xff] }
 0x235   :  { %v191_v12 = vpop.permute.xlu2 %190 }
 0x236   :  { %vm195_vm5 = vcmp.eq.s32.totalorder %v191_v12, 1 }
 0x23d   :  { %v178_v15 = vpop.permute.xlu2 %177 }
 0x23e   :  { %v185_v16 = vmul.f32 %v178_v15, %v173_v13 }
 0x240   :  { %v197_v17 = vsel %vm195_vm5, %v185_v16, 0.0 }
 0x241   :  { %v203_v18 = vadd.f32 %v228_v14, %v197_v17 }
 0x243   :  { %205 = vst.msk [vmem:[%s327_s5] sm:$0xff] %vm30_vm2, %v203_v18 }
 0x245   :  { %v183_v0 = vpop.permute.xlu2 %182 }
 0x246   :  { %v186_v20 = vmul.f32 %v183_v0, %v174_v19 }
 0x24d   :  { %v194_v21 = vpop.permute.xlu2 %193 }
 0x24e   :  { %vm196_vm6 = vcmp.eq.s32.totalorder %v194_v21, 1 }
 0x24f   :  { %v198_v22 = vsel %vm196_vm6, %v186_v20, 0.0 }
 0x250   :  { %v204_v23 = vadd.f32 %v228_v14, %v198_v22 }
 0x252   :  { %206 = vst.msk [vmem:[%s327_s5 + $0x8] sm:$0xff] %vm30_vm2, %v204_v23 }

</bundles_post_ra>
